<compile_context>
chip_gen: v5e
topology: v5e:2x2
jax: 0.10.0
libtpu: 0.0.40
codegen_flags: <defaults>
</compile_context>

<pallas_src>
import numpy as np
import jax
import jax.numpy as jnp
from jax import lax
from jax.experimental import pallas as pl
from jax.experimental.pallas import tpu as pltpu

# ----------------------------- vocab (char level) -----------------------------
idxtochar = [chr(ord('a') + i) for i in range(26)] + ['<unk>', '<start>', '<end>']
chartoidx = {c: i for i, c in enumerate(idxtochar)}
VOCAB = len(idxtochar)          # 29
START_ID = chartoidx['<start>']
END_ID = chartoidx['<end>']
UNK_ID = chartoidx['<unk>']

EMBED_DIM = 50
HIDDEN = 256
FEAT_DIM = 2048
SPATIAL = 7                     # trunk feature map is 7x7
CAPTION_LEN = 8


# ------------------------------- Pallas kernel --------------------------------
def captioning_kernel(cap_ref,       # SMEM (L,)    int32  caption ids
                      mask_ref,      # SMEM (L-1,)  int32  1 while target != <end>, else 0
                      h0_ref,        # VMEM (1, 256)   f32   fc(avgpool(trunk))  (from wrapper)
                      emb_proj_ref,  # VMEM (V, 256)   bf16  emb @ W_ih + b_ih + b_hh
                      w_hh_ref,      # VMEM (256, 256) bf16
                      out_w_ref,     # VMEM (256, V)   bf16
                      out_b_ref,     # VMEM (1, V)     f32
                      loss_ref):     # VMEM (1, 1)     f32 output
    V = emb_proj_ref.shape[0]
    max_steps = cap_ref.shape[0] - 1                                        # static (7)

    iota_row = lax.broadcasted_iota(jnp.int32, (1, V), 1)                   # (1, V)
    out_b = out_b_ref[...]                                                  # hoisted invariant

    def body(i, carry):
        hidden, cur_id, loss_acc = carry

        tgt = cap_ref[i + 1]                                                # SMEM scalar
        active = mask_ref[i].astype(jnp.float32)                            # SMEM scalar (0/1)

        # embedding lookup fused with the RNNCell input projection on the (idle) MXU:
        # onehot(cur) @ (emb @ W_ih + b) == emb[cur] @ W_ih + b.  The one-hot selects a
        # single row, so the bf16 staging only rounds the pre-fused table once.
        onehot = (iota_row == cur_id).astype(jnp.bfloat16)                  # (1, V)
        x_proj = jnp.dot(onehot, emb_proj_ref[...],
                         preferred_element_type=jnp.float32)                # (1, 256) f32

        # recurrent projection (independent of x_proj -> overlaps on the MXU)
        h_proj = jnp.dot(hidden.astype(jnp.bfloat16), w_hh_ref[...],
                         preferred_element_type=jnp.float32)                # (1, 256) f32
        h_new = jnp.tanh(x_proj + h_proj)                                   # (1, 256) f32

        # output layer: bf16 operands, f32 accumulation
        logits = (jnp.dot(h_new.astype(jnp.bfloat16), out_w_ref[...],
                          preferred_element_type=jnp.float32)
                  + out_b)                                                  # (1, V) f32

        # greedy argmax directly on logits (argmax(softmax(x)) == argmax(x));
        # first-index-attaining-max tie-break matches np.argmax.
        m = jnp.max(logits, axis=-1, keepdims=True)
        next_id = jnp.min(jnp.where(logits >= m, iota_row, V),
                          axis=-1, keepdims=True)                           # (1, 1) int32

        # softmax only for the loss term (the torch code applies CrossEntropy to *probs*;
        # intentional, matches the torch source and the numpy reference).
        e = jnp.exp(logits - m)                                             # f32, max(e) == 1.0
        inv_s = 1.0 / jnp.sum(e, axis=-1, keepdims=True)                    # off the recurrent path
        probs = e * inv_s
        # max(probs) == max(e) * inv_s == exp(0) * inv_s == inv_s exactly -> no second XLU max.
        lse = jnp.log(jnp.sum(jnp.exp(probs - inv_s), axis=-1, keepdims=True)) + inv_s
        p_t = jnp.sum(jnp.where(iota_row == tgt, probs, 0.0), axis=-1, keepdims=True)

        # only the loss needs gating: post-<end> hidden / cur_id never affect the result.
        loss_acc = loss_acc + (lse - p_t) * active
        return h_new, next_id, loss_acc

    cur0 = jnp.full((1, 1), cap_ref[0], dtype=jnp.int32)
    init = (h0_ref[...], cur0, jnp.zeros((1, 1), jnp.float32))
    # static, tiny trip count -> fully unroll so the LLO scheduler can overlap work across steps
    _, _, loss = lax.fori_loop(0, max_steps, body, init, unroll=True)
    loss_ref[...] = loss


def custom_resnet_loss(image_featmap_nchw, caption, params):
    """image_featmap_nchw: (1, 2048, 7, 7) frozen-trunk output; caption: (L,) int32."""
    n, c, h, w = image_featmap_nchw.shape
    assert n == 1 and c == FEAT_DIM

    # backbone tail in the XLA wrapper (f32): global average pool + the replaced fc layer.
    # Keeps the ~1 MiB fc_w DMA and the M=1/K=2048 GEMV out of the un-pipelined kernel.
    feat = jnp.mean(image_featmap_nchw.astype(jnp.float32), axis=(2, 3))    # (1, 2048)
    hidden0 = feat @ params['fc_w'] + params['fc_b']                        # (1, 256) f32

    # pre-fuse the RNNCell input projection, the embedding table and both biases (one-time, tiny)
    emb_proj = (params['emb'] @ params['w_ih']
                + params['b_ih'] + params['b_hh'])                          # (V, 256)

    caption = caption.astype(jnp.int32)
    # step i contributes loss iff caption[j] != <end> for every j in 1..i+1
    active_mask = jnp.cumprod((caption[1:] != END_ID).astype(jnp.int32))    # (L-1,)

    out = pl.pallas_call(
        captioning_kernel,
        out_shape=jax.ShapeDtypeStruct((1, 1), jnp.float32),
        in_specs=[
            pl.BlockSpec(memory_space=pltpu.MemorySpace.SMEM),   # caption
            pl.BlockSpec(memory_space=pltpu.MemorySpace.SMEM),   # active_mask
            pl.BlockSpec(memory_space=pltpu.MemorySpace.VMEM),   # hidden0
            pl.BlockSpec(memory_space=pltpu.MemorySpace.VMEM),   # emb_proj
            pl.BlockSpec(memory_space=pltpu.MemorySpace.VMEM),   # w_hh
            pl.BlockSpec(memory_space=pltpu.MemorySpace.VMEM),   # out_w
            pl.BlockSpec(memory_space=pltpu.MemorySpace.VMEM),   # out_b
        ],
        out_specs=pl.BlockSpec(memory_space=pltpu.MemorySpace.VMEM),
    )(caption,
      active_mask,
      hidden0.astype(jnp.float32),
      emb_proj.astype(jnp.bfloat16),           # bf16 only feeds the MXU
      params['w_hh'].astype(jnp.bfloat16),
      params['out_w'].astype(jnp.bfloat16),
      params['out_b'].astype(jnp.float32))
    return out[0, 0]


# ------------------------------ pure-numpy reference ------------------------------
def reference_loss(image_featmap_nchw, caption, params):
    fm = np.asarray(image_featmap_nchw, dtype=np.float32)[0]        # (2048, 7, 7)
    feat = fm.reshape(FEAT_DIM, -1).mean(axis=1)                    # (2048,)
    p = {k: np.asarray(v, dtype=np.float32) for k, v in params.items()}
    hidden = feat @ p['fc_w'] + p['fc_b'][0]
    cap = np.asarray(caption)
    total, i, cur = 0.0, 0, int(cap[0])
    while True:
        tgt = int(cap[i + 1])
        if tgt == END_ID:
            break
        x = p['emb'][cur]
        hidden = np.tanh(x @ p['w_ih'] + p['b_ih'][0] + hidden @ p['w_hh'] + p['b_hh'][0])
        logits = hidden @ p['out_w'] + p['out_b'][0]
        e = np.exp(logits - logits.max())
        probs = e / e.sum()
        nxt = int(np.argmax(probs))
        lse = np.log(np.exp(probs - probs.max()).sum()) + probs.max()
        total += float(lse - probs[tgt])
        cur = nxt
        i += 1
    return np.float32(total)


# ------------------------------------ main ------------------------------------
if __name__ == "__main__":
    key = jax.random.PRNGKey(0)
    ks = jax.random.split(key, 8)
    scale = 0.02

    params = {
        'fc_w':  scale * jax.random.normal(ks[0], (FEAT_DIM, HIDDEN), jnp.float32),
        'fc_b':  scale * jax.random.normal(ks[1], (1, HIDDEN), jnp.float32),
        'emb':   jax.random.normal(ks[2], (VOCAB, EMBED_DIM), jnp.float32),
        'w_ih':  scale * jax.random.normal(ks[3], (EMBED_DIM, HIDDEN), jnp.float32),
        'b_ih':  scale * jax.random.normal(ks[4], (1, HIDDEN), jnp.float32),
        'w_hh':  scale * jax.random.normal(ks[5], (HIDDEN, HIDDEN), jnp.float32),
        'b_hh':  scale * jax.random.normal(ks[6], (1, HIDDEN), jnp.float32),
        'out_w': scale * jax.random.normal(ks[7], (HIDDEN, VOCAB), jnp.float32),
        'out_b': jnp.zeros((1, VOCAB), jnp.float32),
    }

    # frozen-trunk feature map for one image (NCHW, batch=1)
    image_featmap = jax.random.normal(jax.random.PRNGKey(1),
                                      (1, FEAT_DIM, SPATIAL, SPATIAL), jnp.float32)

    # caption "<start> c a t <end>" padded with <unk>
    cap_ids = [START_ID, chartoidx['c'], chartoidx['a'], chartoidx['t'], END_ID]
    cap_ids += [UNK_ID] * (CAPTION_LEN - len(cap_ids))
    caption = jnp.array(cap_ids, dtype=jnp.int32)

    loss = custom_resnet_loss(image_featmap, caption, params)
    loss = jax.block_until_ready(loss)

    ref = reference_loss(image_featmap, caption, params)
    np.testing.assert_allclose(np.asarray(loss), ref, rtol=2e-2, atol=2e-2)

    print("KERNEL_OK")
</pallas_src>

<mosaic_0001>
module attributes {stable_mosaic.version = 11 : i64} {
  func.func @captioning_kernel(%arg0: memref<8xi32, #tpu.memory_space<smem>>, %arg1: memref<7xi32, #tpu.memory_space<smem>>, %arg2: memref<1x256xf32, #tpu.memory_space<vmem>>, %arg3: memref<29x256xbf16, #tpu.memory_space<vmem>>, %arg4: memref<256x256xbf16, #tpu.memory_space<vmem>>, %arg5: memref<256x29xbf16, #tpu.memory_space<vmem>>, %arg6: memref<1x29xf32, #tpu.memory_space<vmem>>, %arg7: memref<1x1xf32, #tpu.memory_space<vmem>>) attributes {dimension_semantics = [], scalar_prefetch = 0 : i64, scratch_operands = 0 : i64, tpu.core_type = #tpu.core_type<tc>} {
    %0 = tpu.iota {dimensions = array<i32: 1>} : vector<1x29xi32>
    %c0 = arith.constant 0 : index
    %c0_0 = arith.constant 0 : index
    %1 = vector.load %arg6[%c0, %c0_0] : memref<1x29xf32, #tpu.memory_space<vmem>>, vector<1x29xf32>
    %c0_1 = arith.constant 0 : index
    %2 = memref.load %arg0[%c0_1] : memref<8xi32, #tpu.memory_space<smem>>
    %3 = vector.broadcast %2 : i32 to vector<1x1xi32>
    %c0_2 = arith.constant 0 : index
    %c0_3 = arith.constant 0 : index
    %4 = vector.load %arg2[%c0_2, %c0_3] : memref<1x256xf32, #tpu.memory_space<vmem>>, vector<1x256xf32>
    %cst = arith.constant 0.000000e+00 : f32
    %5 = vector.broadcast %cst : f32 to vector<1x1xf32>
    %c0_i32 = arith.constant 0 : i32
    %c1_i32 = arith.constant 1 : i32
    %6 = arith.addi %c0_i32, %c1_i32 : i32
    %7 = arith.index_cast %6 : i32 to index
    %8 = memref.load %arg0[%7] : memref<8xi32, #tpu.memory_space<smem>>
    %9 = arith.index_cast %c0_i32 : i32 to index
    %10 = memref.load %arg1[%9] : memref<7xi32, #tpu.memory_space<smem>>
    %11 = arith.sitofp %10 : i32 to f32
    %12 = vector.broadcast %3 : vector<1x1xi32> to vector<1x29xi32>
    %13 = arith.cmpi eq, %0, %12 : vector<1x29xi32>
    %14 = arith.extui %13 : vector<1x29xi1> to vector<1x29xi32>
    %15 = arith.sitofp %14 : vector<1x29xi32> to vector<1x29xf32>
    %16 = arith.truncf %15 : vector<1x29xf32> to vector<1x29xbf16>
    %c0_4 = arith.constant 0 : index
    %c0_5 = arith.constant 0 : index
    %17 = vector.load %arg3[%c0_4, %c0_5] : memref<29x256xbf16, #tpu.memory_space<vmem>>, vector<29x256xbf16>
    %cst_6 = arith.constant dense<0.000000e+00> : vector<1x256xf32>
    %18 = tpu.matmul %16, %17, %cst_6 {dimension_numbers = #tpu.dot_dimension_numbers<[1], [0], [0], [1], [0, 0, 1, 1], [], []>} : vector<1x29xbf16>, vector<29x256xbf16>, vector<1x256xf32> -> vector<1x256xf32>
    %19 = arith.truncf %4 : vector<1x256xf32> to vector<1x256xbf16>
    %c0_7 = arith.constant 0 : index
    %c0_8 = arith.constant 0 : index
    %20 = vector.load %arg4[%c0_7, %c0_8] : memref<256x256xbf16, #tpu.memory_space<vmem>>, vector<256x256xbf16>
    %cst_9 = arith.constant dense<0.000000e+00> : vector<1x256xf32>
    %21 = tpu.matmul %19, %20, %cst_9 {dimension_numbers = #tpu.dot_dimension_numbers<[1], [0], [0], [1], [0, 0, 1, 1], [], []>} : vector<1x256xbf16>, vector<256x256xbf16>, vector<1x256xf32> -> vector<1x256xf32>
    %22 = arith.addf %18, %21 : vector<1x256xf32>
    %23 = math.tanh %22 : vector<1x256xf32>
    %24 = arith.truncf %23 : vector<1x256xf32> to vector<1x256xbf16>
    %c0_10 = arith.constant 0 : index
    %c0_11 = arith.constant 0 : index
    %25 = vector.load %arg5[%c0_10, %c0_11] : memref<256x29xbf16, #tpu.memory_space<vmem>>, vector<256x29xbf16>
    %cst_12 = arith.constant dense<0.000000e+00> : vector<1x29xf32>
    %26 = tpu.matmul %24, %25, %cst_12 {dimension_numbers = #tpu.dot_dimension_numbers<[1], [0], [0], [1], [0, 0, 1, 1], [], []>} : vector<1x256xbf16>, vector<256x29xbf16>, vector<1x29xf32> -> vector<1x29xf32>
    %27 = arith.addf %26, %1 : vector<1x29xf32>
    %cst_13 = arith.constant dense<0xFF800000> : vector<1xf32>
    %28 = vector.multi_reduction <maximumf>, %27, %cst_13 [1] : vector<1x29xf32> to vector<1xf32>
    %29 = vector.shape_cast %28 : vector<1xf32> to vector<1x1xf32>
    %30 = vector.broadcast %29 : vector<1x1xf32> to vector<1x29xf32>
    %31 = arith.cmpf oge, %27, %30 : vector<1x29xf32>
    %c29_i32 = arith.constant 29 : i32
    %32 = vector.broadcast %c29_i32 : i32 to vector<1x29xi32>
    %33 = arith.select %31, %0, %32 : vector<1x29xi1>, vector<1x29xi32>
    %cst_14 = arith.constant dense<2147483647> : vector<1xi32>
    %34 = vector.multi_reduction <minsi>, %33, %cst_14 [1] : vector<1x29xi32> to vector<1xi32>
    %35 = vector.shape_cast %34 : vector<1xi32> to vector<1x1xi32>
    %36 = vector.broadcast %29 : vector<1x1xf32> to vector<1x29xf32>
    %37 = arith.subf %27, %36 : vector<1x29xf32>
    %38 = math.exp %37 : vector<1x29xf32>
    %cst_15 = arith.constant dense<0.000000e+00> : vector<1xf32>
    %39 = vector.multi_reduction <add>, %38, %cst_15 [1] : vector<1x29xf32> to vector<1xf32>
    %40 = vector.shape_cast %39 : vector<1xf32> to vector<1x1xf32>
    %cst_16 = arith.constant 1.000000e+00 : f32
    %41 = vector.broadcast %cst_16 : f32 to vector<1x1xf32>
    %42 = arith.divf %41, %40 : vector<1x1xf32>
    %43 = vector.broadcast %42 : vector<1x1xf32> to vector<1x29xf32>
    %44 = arith.mulf %38, %43 : vector<1x29xf32>
    %45 = vector.broadcast %42 : vector<1x1xf32> to vector<1x29xf32>
    %46 = arith.subf %44, %45 : vector<1x29xf32>
    %47 = math.exp %46 : vector<1x29xf32>
    %cst_17 = arith.constant dense<0.000000e+00> : vector<1xf32>
    %48 = vector.multi_reduction <add>, %47, %cst_17 [1] : vector<1x29xf32> to vector<1xf32>
    %49 = vector.shape_cast %48 : vector<1xf32> to vector<1x1xf32>
    %50 = math.log %49 : vector<1x1xf32>
    %51 = arith.addf %50, %42 : vector<1x1xf32>
    %52 = vector.broadcast %8 : i32 to vector<1x29xi32>
    %53 = arith.cmpi eq, %0, %52 : vector<1x29xi32>
    %cst_18 = arith.constant 0.000000e+00 : f32
    %54 = vector.broadcast %cst_18 : f32 to vector<1x29xf32>
    %55 = arith.select %53, %44, %54 : vector<1x29xi1>, vector<1x29xf32>
    %cst_19 = arith.constant dense<0.000000e+00> : vector<1xf32>
    %56 = vector.multi_reduction <add>, %55, %cst_19 [1] : vector<1x29xf32> to vector<1xf32>
    %57 = vector.shape_cast %56 : vector<1xf32> to vector<1x1xf32>
    %58 = arith.subf %51, %57 : vector<1x1xf32>
    %59 = vector.broadcast %11 : f32 to vector<1x1xf32>
    %60 = arith.mulf %58, %59 : vector<1x1xf32>
    %61 = arith.addf %5, %60 : vector<1x1xf32>
    %c1_i32_20 = arith.constant 1 : i32
    %c1_i32_21 = arith.constant 1 : i32
    %62 = arith.addi %c1_i32_20, %c1_i32_21 : i32
    %63 = arith.index_cast %62 : i32 to index
    %64 = memref.load %arg0[%63] : memref<8xi32, #tpu.memory_space<smem>>
    %65 = arith.index_cast %c1_i32_20 : i32 to index
    %66 = memref.load %arg1[%65] : memref<7xi32, #tpu.memory_space<smem>>
    %67 = arith.sitofp %66 : i32 to f32
    %68 = vector.broadcast %35 : vector<1x1xi32> to vector<1x29xi32>
    %69 = arith.cmpi eq, %0, %68 : vector<1x29xi32>
    %70 = arith.extui %69 : vector<1x29xi1> to vector<1x29xi32>
    %71 = arith.sitofp %70 : vector<1x29xi32> to vector<1x29xf32>
    %72 = arith.truncf %71 : vector<1x29xf32> to vector<1x29xbf16>
    %c0_22 = arith.constant 0 : index
    %c0_23 = arith.constant 0 : index
    %73 = vector.load %arg3[%c0_22, %c0_23] : memref<29x256xbf16, #tpu.memory_space<vmem>>, vector<29x256xbf16>
    %cst_24 = arith.constant dense<0.000000e+00> : vector<1x256xf32>
    %74 = tpu.matmul %72, %73, %cst_24 {dimension_numbers = #tpu.dot_dimension_numbers<[1], [0], [0], [1], [0, 0, 1, 1], [], []>} : vector<1x29xbf16>, vector<29x256xbf16>, vector<1x256xf32> -> vector<1x256xf32>
    %75 = arith.truncf %23 : vector<1x256xf32> to vector<1x256xbf16>
    %c0_25 = arith.constant 0 : index
    %c0_26 = arith.constant 0 : index
    %76 = vector.load %arg4[%c0_25, %c0_26] : memref<256x256xbf16, #tpu.memory_space<vmem>>, vector<256x256xbf16>
    %cst_27 = arith.constant dense<0.000000e+00> : vector<1x256xf32>
    %77 = tpu.matmul %75, %76, %cst_27 {dimension_numbers = #tpu.dot_dimension_numbers<[1], [0], [0], [1], [0, 0, 1, 1], [], []>} : vector<1x256xbf16>, vector<256x256xbf16>, vector<1x256xf32> -> vector<1x256xf32>
    %78 = arith.addf %74, %77 : vector<1x256xf32>
    %79 = math.tanh %78 : vector<1x256xf32>
    %80 = arith.truncf %79 : vector<1x256xf32> to vector<1x256xbf16>
    %c0_28 = arith.constant 0 : index
    %c0_29 = arith.constant 0 : index
    %81 = vector.load %arg5[%c0_28, %c0_29] : memref<256x29xbf16, #tpu.memory_space<vmem>>, vector<256x29xbf16>
    %cst_30 = arith.constant dense<0.000000e+00> : vector<1x29xf32>
    %82 = tpu.matmul %80, %81, %cst_30 {dimension_numbers = #tpu.dot_dimension_numbers<[1], [0], [0], [1], [0, 0, 1, 1], [], []>} : vector<1x256xbf16>, vector<256x29xbf16>, vector<1x29xf32> -> vector<1x29xf32>
    %83 = arith.addf %82, %1 : vector<1x29xf32>
    %cst_31 = arith.constant dense<0xFF800000> : vector<1xf32>
    %84 = vector.multi_reduction <maximumf>, %83, %cst_31 [1] : vector<1x29xf32> to vector<1xf32>
    %85 = vector.shape_cast %84 : vector<1xf32> to vector<1x1xf32>
    %86 = vector.broadcast %85 : vector<1x1xf32> to vector<1x29xf32>
    %87 = arith.cmpf oge, %83, %86 : vector<1x29xf32>
    %c29_i32_32 = arith.constant 29 : i32
    %88 = vector.broadcast %c29_i32_32 : i32 to vector<1x29xi32>
    %89 = arith.select %87, %0, %88 : vector<1x29xi1>, vector<1x29xi32>
    %cst_33 = arith.constant dense<2147483647> : vector<1xi32>
    %90 = vector.multi_reduction <minsi>, %89, %cst_33 [1] : vector<1x29xi32> to vector<1xi32>
    %91 = vector.shape_cast %90 : vector<1xi32> to vector<1x1xi32>
    %92 = vector.broadcast %85 : vector<1x1xf32> to vector<1x29xf32>
    %93 = arith.subf %83, %92 : vector<1x29xf32>
    %94 = math.exp %93 : vector<1x29xf32>
    %cst_34 = arith.constant dense<0.000000e+00> : vector<1xf32>
    %95 = vector.multi_reduction <add>, %94, %cst_34 [1] : vector<1x29xf32> to vector<1xf32>
    %96 = vector.shape_cast %95 : vector<1xf32> to vector<1x1xf32>
    %cst_35 = arith.constant 1.000000e+00 : f32
    %97 = vector.broadcast %cst_35 : f32 to vector<1x1xf32>
    %98 = arith.divf %97, %96 : vector<1x1xf32>
    %99 = vector.broadcast %98 : vector<1x1xf32> to vector<1x29xf32>
    %100 = arith.mulf %94, %99 : vector<1x29xf32>
    %101 = vector.broadcast %98 : vector<1x1xf32> to vector<1x29xf32>
    %102 = arith.subf %100, %101 : vector<1x29xf32>
    %103 = math.exp %102 : vector<1x29xf32>
    %cst_36 = arith.constant dense<0.000000e+00> : vector<1xf32>
    %104 = vector.multi_reduction <add>, %103, %cst_36 [1] : vector<1x29xf32> to vector<1xf32>
    %105 = vector.shape_cast %104 : vector<1xf32> to vector<1x1xf32>
    %106 = math.log %105 : vector<1x1xf32>
    %107 = arith.addf %106, %98 : vector<1x1xf32>
    %108 = vector.broadcast %64 : i32 to vector<1x29xi32>
    %109 = arith.cmpi eq, %0, %108 : vector<1x29xi32>
    %cst_37 = arith.constant 0.000000e+00 : f32
    %110 = vector.broadcast %cst_37 : f32 to vector<1x29xf32>
    %111 = arith.select %109, %100, %110 : vector<1x29xi1>, vector<1x29xf32>
    %cst_38 = arith.constant dense<0.000000e+00> : vector<1xf32>
    %112 = vector.multi_reduction <add>, %111, %cst_38 [1] : vector<1x29xf32> to vector<1xf32>
    %113 = vector.shape_cast %112 : vector<1xf32> to vector<1x1xf32>
    %114 = arith.subf %107, %113 : vector<1x1xf32>
    %115 = vector.broadcast %67 : f32 to vector<1x1xf32>
    %116 = arith.mulf %114, %115 : vector<1x1xf32>
    %117 = arith.addf %61, %116 : vector<1x1xf32>
    %c2_i32 = arith.constant 2 : i32
    %c1_i32_39 = arith.constant 1 : i32
    %118 = arith.addi %c2_i32, %c1_i32_39 : i32
    %119 = arith.index_cast %118 : i32 to index
    %120 = memref.load %arg0[%119] : memref<8xi32, #tpu.memory_space<smem>>
    %121 = arith.index_cast %c2_i32 : i32 to index
    %122 = memref.load %arg1[%121] : memref<7xi32, #tpu.memory_space<smem>>
    %123 = arith.sitofp %122 : i32 to f32
    %124 = vector.broadcast %91 : vector<1x1xi32> to vector<1x29xi32>
    %125 = arith.cmpi eq, %0, %124 : vector<1x29xi32>
    %126 = arith.extui %125 : vector<1x29xi1> to vector<1x29xi32>
    %127 = arith.sitofp %126 : vector<1x29xi32> to vector<1x29xf32>
    %128 = arith.truncf %127 : vector<1x29xf32> to vector<1x29xbf16>
    %c0_40 = arith.constant 0 : index
    %c0_41 = arith.constant 0 : index
    %129 = vector.load %arg3[%c0_40, %c0_41] : memref<29x256xbf16, #tpu.memory_space<vmem>>, vector<29x256xbf16>
    %cst_42 = arith.constant dense<0.000000e+00> : vector<1x256xf32>
    %130 = tpu.matmul %128, %129, %cst_42 {dimension_numbers = #tpu.dot_dimension_numbers<[1], [0], [0], [1], [0, 0, 1, 1], [], []>} : vector<1x29xbf16>, vector<29x256xbf16>, vector<1x256xf32> -> vector<1x256xf32>
    %131 = arith.truncf %79 : vector<1x256xf32> to vector<1x256xbf16>
    %c0_43 = arith.constant 0 : index
    %c0_44 = arith.constant 0 : index
    %132 = vector.load %arg4[%c0_43, %c0_44] : memref<256x256xbf16, #tpu.memory_space<vmem>>, vector<256x256xbf16>
    %cst_45 = arith.constant dense<0.000000e+00> : vector<1x256xf32>
    %133 = tpu.matmul %131, %132, %cst_45 {dimension_numbers = #tpu.dot_dimension_numbers<[1], [0], [0], [1], [0, 0, 1, 1], [], []>} : vector<1x256xbf16>, vector<256x256xbf16>, vector<1x256xf32> -> vector<1x256xf32>
    %134 = arith.addf %130, %133 : vector<1x256xf32>
    %135 = math.tanh %134 : vector<1x256xf32>
    %136 = arith.truncf %135 : vector<1x256xf32> to vector<1x256xbf16>
    %c0_46 = arith.constant 0 : index
    %c0_47 = arith.constant 0 : index
    %137 = vector.load %arg5[%c0_46, %c0_47] : memref<256x29xbf16, #tpu.memory_space<vmem>>, vector<256x29xbf16>
    %cst_48 = arith.constant dense<0.000000e+00> : vector<1x29xf32>
    %138 = tpu.matmul %136, %137, %cst_48 {dimension_numbers = #tpu.dot_dimension_numbers<[1], [0], [0], [1], [0, 0, 1, 1], [], []>} : vector<1x256xbf16>, vector<256x29xbf16>, vector<1x29xf32> -> vector<1x29xf32>
    %139 = arith.addf %138, %1 : vector<1x29xf32>
    %cst_49 = arith.constant dense<0xFF800000> : vector<1xf32>
    %140 = vector.multi_reduction <maximumf>, %139, %cst_49 [1] : vector<1x29xf32> to vector<1xf32>
    %141 = vector.shape_cast %140 : vector<1xf32> to vector<1x1xf32>
    %142 = vector.broadcast %141 : vector<1x1xf32> to vector<1x29xf32>
    %143 = arith.cmpf oge, %139, %142 : vector<1x29xf32>
    %c29_i32_50 = arith.constant 29 : i32
    %144 = vector.broadcast %c29_i32_50 : i32 to vector<1x29xi32>
    %145 = arith.select %143, %0, %144 : vector<1x29xi1>, vector<1x29xi32>
    %cst_51 = arith.constant dense<2147483647> : vector<1xi32>
    %146 = vector.multi_reduction <minsi>, %145, %cst_51 [1] : vector<1x29xi32> to vector<1xi32>
    %147 = vector.shape_cast %146 : vector<1xi32> to vector<1x1xi32>
    %148 = vector.broadcast %141 : vector<1x1xf32> to vector<1x29xf32>
    %149 = arith.subf %139, %148 : vector<1x29xf32>
    %150 = math.exp %149 : vector<1x29xf32>
    %cst_52 = arith.constant dense<0.000000e+00> : vector<1xf32>
    %151 = vector.multi_reduction <add>, %150, %cst_52 [1] : vector<1x29xf32> to vector<1xf32>
    %152 = vector.shape_cast %151 : vector<1xf32> to vector<1x1xf32>
    %cst_53 = arith.constant 1.000000e+00 : f32
    %153 = vector.broadcast %cst_53 : f32 to vector<1x1xf32>
    %154 = arith.divf %153, %152 : vector<1x1xf32>
    %155 = vector.broadcast %154 : vector<1x1xf32> to vector<1x29xf32>
    %156 = arith.mulf %150, %155 : vector<1x29xf32>
    %157 = vector.broadcast %154 : vector<1x1xf32> to vector<1x29xf32>
    %158 = arith.subf %156, %157 : vector<1x29xf32>
    %159 = math.exp %158 : vector<1x29xf32>
    %cst_54 = arith.constant dense<0.000000e+00> : vector<1xf32>
    %160 = vector.multi_reduction <add>, %159, %cst_54 [1] : vector<1x29xf32> to vector<1xf32>
    %161 = vector.shape_cast %160 : vector<1xf32> to vector<1x1xf32>
    %162 = math.log %161 : vector<1x1xf32>
    %163 = arith.addf %162, %154 : vector<1x1xf32>
    %164 = vector.broadcast %120 : i32 to vector<1x29xi32>
    %165 = arith.cmpi eq, %0, %164 : vector<1x29xi32>
    %cst_55 = arith.constant 0.000000e+00 : f32
    %166 = vector.broadcast %cst_55 : f32 to vector<1x29xf32>
    %167 = arith.select %165, %156, %166 : vector<1x29xi1>, vector<1x29xf32>
    %cst_56 = arith.constant dense<0.000000e+00> : vector<1xf32>
    %168 = vector.multi_reduction <add>, %167, %cst_56 [1] : vector<1x29xf32> to vector<1xf32>
    %169 = vector.shape_cast %168 : vector<1xf32> to vector<1x1xf32>
    %170 = arith.subf %163, %169 : vector<1x1xf32>
    %171 = vector.broadcast %123 : f32 to vector<1x1xf32>
    %172 = arith.mulf %170, %171 : vector<1x1xf32>
    %173 = arith.addf %117, %172 : vector<1x1xf32>
    %c3_i32 = arith.constant 3 : i32
    %c1_i32_57 = arith.constant 1 : i32
    %174 = arith.addi %c3_i32, %c1_i32_57 : i32
    %175 = arith.index_cast %174 : i32 to index
    %176 = memref.load %arg0[%175] : memref<8xi32, #tpu.memory_space<smem>>
    %177 = arith.index_cast %c3_i32 : i32 to index
    %178 = memref.load %arg1[%177] : memref<7xi32, #tpu.memory_space<smem>>
    %179 = arith.sitofp %178 : i32 to f32
    %180 = vector.broadcast %147 : vector<1x1xi32> to vector<1x29xi32>
    %181 = arith.cmpi eq, %0, %180 : vector<1x29xi32>
    %182 = arith.extui %181 : vector<1x29xi1> to vector<1x29xi32>
    %183 = arith.sitofp %182 : vector<1x29xi32> to vector<1x29xf32>
    %184 = arith.truncf %183 : vector<1x29xf32> to vector<1x29xbf16>
    %c0_58 = arith.constant 0 : index
    %c0_59 = arith.constant 0 : index
    %185 = vector.load %arg3[%c0_58, %c0_59] : memref<29x256xbf16, #tpu.memory_space<vmem>>, vector<29x256xbf16>
    %cst_60 = arith.constant dense<0.000000e+00> : vector<1x256xf32>
    %186 = tpu.matmul %184, %185, %cst_60 {dimension_numbers = #tpu.dot_dimension_numbers<[1], [0], [0], [1], [0, 0, 1, 1], [], []>} : vector<1x29xbf16>, vector<29x256xbf16>, vector<1x256xf32> -> vector<1x256xf32>
    %187 = arith.truncf %135 : vector<1x256xf32> to vector<1x256xbf16>
    %c0_61 = arith.constant 0 : index
    %c0_62 = arith.constant 0 : index
    %188 = vector.load %arg4[%c0_61, %c0_62] : memref<256x256xbf16, #tpu.memory_space<vmem>>, vector<256x256xbf16>
    %cst_63 = arith.constant dense<0.000000e+00> : vector<1x256xf32>
    %189 = tpu.matmul %187, %188, %cst_63 {dimension_numbers = #tpu.dot_dimension_numbers<[1], [0], [0], [1], [0, 0, 1, 1], [], []>} : vector<1x256xbf16>, vector<256x256xbf16>, vector<1x256xf32> -> vector<1x256xf32>
    %190 = arith.addf %186, %189 : vector<1x256xf32>
    %191 = math.tanh %190 : vector<1x256xf32>
    %192 = arith.truncf %191 : vector<1x256xf32> to vector<1x256xbf16>
    %c0_64 = arith.constant 0 : index
    %c0_65 = arith.constant 0 : index
    %193 = vector.load %arg5[%c0_64, %c0_65] : memref<256x29xbf16, #tpu.memory_space<vmem>>, vector<256x29xbf16>
    %cst_66 = arith.constant dense<0.000000e+00> : vector<1x29xf32>
    %194 = tpu.matmul %192, %193, %cst_66 {dimension_numbers = #tpu.dot_dimension_numbers<[1], [0], [0], [1], [0, 0, 1, 1], [], []>} : vector<1x256xbf16>, vector<256x29xbf16>, vector<1x29xf32> -> vector<1x29xf32>
    %195 = arith.addf %194, %1 : vector<1x29xf32>
    %cst_67 = arith.constant dense<0xFF800000> : vector<1xf32>
    %196 = vector.multi_reduction <maximumf>, %195, %cst_67 [1] : vector<1x29xf32> to vector<1xf32>
    %197 = vector.shape_cast %196 : vector<1xf32> to vector<1x1xf32>
    %198 = vector.broadcast %197 : vector<1x1xf32> to vector<1x29xf32>
    %199 = arith.cmpf oge, %195, %198 : vector<1x29xf32>
    %c29_i32_68 = arith.constant 29 : i32
    %200 = vector.broadcast %c29_i32_68 : i32 to vector<1x29xi32>
    %201 = arith.select %199, %0, %200 : vector<1x29xi1>, vector<1x29xi32>
    %cst_69 = arith.constant dense<2147483647> : vector<1xi32>
    %202 = vector.multi_reduction <minsi>, %201, %cst_69 [1] : vector<1x29xi32> to vector<1xi32>
    %203 = vector.shape_cast %202 : vector<1xi32> to vector<1x1xi32>
    %204 = vector.broadcast %197 : vector<1x1xf32> to vector<1x29xf32>
    %205 = arith.subf %195, %204 : vector<1x29xf32>
    %206 = math.exp %205 : vector<1x29xf32>
    %cst_70 = arith.constant dense<0.000000e+00> : vector<1xf32>
    %207 = vector.multi_reduction <add>, %206, %cst_70 [1] : vector<1x29xf32> to vector<1xf32>
    %208 = vector.shape_cast %207 : vector<1xf32> to vector<1x1xf32>
    %cst_71 = arith.constant 1.000000e+00 : f32
    %209 = vector.broadcast %cst_71 : f32 to vector<1x1xf32>
    %210 = arith.divf %209, %208 : vector<1x1xf32>
    %211 = vector.broadcast %210 : vector<1x1xf32> to vector<1x29xf32>
    %212 = arith.mulf %206, %211 : vector<1x29xf32>
    %213 = vector.broadcast %210 : vector<1x1xf32> to vector<1x29xf32>
    %214 = arith.subf %212, %213 : vector<1x29xf32>
    %215 = math.exp %214 : vector<1x29xf32>
    %cst_72 = arith.constant dense<0.000000e+00> : vector<1xf32>
    %216 = vector.multi_reduction <add>, %215, %cst_72 [1] : vector<1x29xf32> to vector<1xf32>
    %217 = vector.shape_cast %216 : vector<1xf32> to vector<1x1xf32>
    %218 = math.log %217 : vector<1x1xf32>
    %219 = arith.addf %218, %210 : vector<1x1xf32>
    %220 = vector.broadcast %176 : i32 to vector<1x29xi32>
    %221 = arith.cmpi eq, %0, %220 : vector<1x29xi32>
    %cst_73 = arith.constant 0.000000e+00 : f32
    %222 = vector.broadcast %cst_73 : f32 to vector<1x29xf32>
    %223 = arith.select %221, %212, %222 : vector<1x29xi1>, vector<1x29xf32>
    %cst_74 = arith.constant dense<0.000000e+00> : vector<1xf32>
    %224 = vector.multi_reduction <add>, %223, %cst_74 [1] : vector<1x29xf32> to vector<1xf32>
    %225 = vector.shape_cast %224 : vector<1xf32> to vector<1x1xf32>
    %226 = arith.subf %219, %225 : vector<1x1xf32>
    %227 = vector.broadcast %179 : f32 to vector<1x1xf32>
    %228 = arith.mulf %226, %227 : vector<1x1xf32>
    %229 = arith.addf %173, %228 : vector<1x1xf32>
    %c4_i32 = arith.constant 4 : i32
    %c1_i32_75 = arith.constant 1 : i32
    %230 = arith.addi %c4_i32, %c1_i32_75 : i32
    %231 = arith.index_cast %230 : i32 to index
    %232 = memref.load %arg0[%231] : memref<8xi32, #tpu.memory_space<smem>>
    %233 = arith.index_cast %c4_i32 : i32 to index
    %234 = memref.load %arg1[%233] : memref<7xi32, #tpu.memory_space<smem>>
    %235 = arith.sitofp %234 : i32 to f32
    %236 = vector.broadcast %203 : vector<1x1xi32> to vector<1x29xi32>
    %237 = arith.cmpi eq, %0, %236 : vector<1x29xi32>
    %238 = arith.extui %237 : vector<1x29xi1> to vector<1x29xi32>
    %239 = arith.sitofp %238 : vector<1x29xi32> to vector<1x29xf32>
    %240 = arith.truncf %239 : vector<1x29xf32> to vector<1x29xbf16>
    %c0_76 = arith.constant 0 : index
    %c0_77 = arith.constant 0 : index
    %241 = vector.load %arg3[%c0_76, %c0_77] : memref<29x256xbf16, #tpu.memory_space<vmem>>, vector<29x256xbf16>
    %cst_78 = arith.constant dense<0.000000e+00> : vector<1x256xf32>
    %242 = tpu.matmul %240, %241, %cst_78 {dimension_numbers = #tpu.dot_dimension_numbers<[1], [0], [0], [1], [0, 0, 1, 1], [], []>} : vector<1x29xbf16>, vector<29x256xbf16>, vector<1x256xf32> -> vector<1x256xf32>
    %243 = arith.truncf %191 : vector<1x256xf32> to vector<1x256xbf16>
    %c0_79 = arith.constant 0 : index
    %c0_80 = arith.constant 0 : index
    %244 = vector.load %arg4[%c0_79, %c0_80] : memref<256x256xbf16, #tpu.memory_space<vmem>>, vector<256x256xbf16>
    %cst_81 = arith.constant dense<0.000000e+00> : vector<1x256xf32>
    %245 = tpu.matmul %243, %244, %cst_81 {dimension_numbers = #tpu.dot_dimension_numbers<[1], [0], [0], [1], [0, 0, 1, 1], [], []>} : vector<1x256xbf16>, vector<256x256xbf16>, vector<1x256xf32> -> vector<1x256xf32>
    %246 = arith.addf %242, %245 : vector<1x256xf32>
    %247 = math.tanh %246 : vector<1x256xf32>
    %248 = arith.truncf %247 : vector<1x256xf32> to vector<1x256xbf16>
    %c0_82 = arith.constant 0 : index
    %c0_83 = arith.constant 0 : index
    %249 = vector.load %arg5[%c0_82, %c0_83] : memref<256x29xbf16, #tpu.memory_space<vmem>>, vector<256x29xbf16>
    %cst_84 = arith.constant dense<0.000000e+00> : vector<1x29xf32>
    %250 = tpu.matmul %248, %249, %cst_84 {dimension_numbers = #tpu.dot_dimension_numbers<[1], [0], [0], [1], [0, 0, 1, 1], [], []>} : vector<1x256xbf16>, vector<256x29xbf16>, vector<1x29xf32> -> vector<1x29xf32>
    %251 = arith.addf %250, %1 : vector<1x29xf32>
    %cst_85 = arith.constant dense<0xFF800000> : vector<1xf32>
    %252 = vector.multi_reduction <maximumf>, %251, %cst_85 [1] : vector<1x29xf32> to vector<1xf32>
    %253 = vector.shape_cast %252 : vector<1xf32> to vector<1x1xf32>
    %254 = vector.broadcast %253 : vector<1x1xf32> to vector<1x29xf32>
    %255 = arith.cmpf oge, %251, %254 : vector<1x29xf32>
    %c29_i32_86 = arith.constant 29 : i32
    %256 = vector.broadcast %c29_i32_86 : i32 to vector<1x29xi32>
    %257 = arith.select %255, %0, %256 : vector<1x29xi1>, vector<1x29xi32>
    %cst_87 = arith.constant dense<2147483647> : vector<1xi32>
    %258 = vector.multi_reduction <minsi>, %257, %cst_87 [1] : vector<1x29xi32> to vector<1xi32>
    %259 = vector.shape_cast %258 : vector<1xi32> to vector<1x1xi32>
    %260 = vector.broadcast %253 : vector<1x1xf32> to vector<1x29xf32>
    %261 = arith.subf %251, %260 : vector<1x29xf32>
    %262 = math.exp %261 : vector<1x29xf32>
    %cst_88 = arith.constant dense<0.000000e+00> : vector<1xf32>
    %263 = vector.multi_reduction <add>, %262, %cst_88 [1] : vector<1x29xf32> to vector<1xf32>
    %264 = vector.shape_cast %263 : vector<1xf32> to vector<1x1xf32>
    %cst_89 = arith.constant 1.000000e+00 : f32
    %265 = vector.broadcast %cst_89 : f32 to vector<1x1xf32>
    %266 = arith.divf %265, %264 : vector<1x1xf32>
    %267 = vector.broadcast %266 : vector<1x1xf32> to vector<1x29xf32>
    %268 = arith.mulf %262, %267 : vector<1x29xf32>
    %269 = vector.broadcast %266 : vector<1x1xf32> to vector<1x29xf32>
    %270 = arith.subf %268, %269 : vector<1x29xf32>
    %271 = math.exp %270 : vector<1x29xf32>
    %cst_90 = arith.constant dense<0.000000e+00> : vector<1xf32>
    %272 = vector.multi_reduction <add>, %271, %cst_90 [1] : vector<1x29xf32> to vector<1xf32>
    %273 = vector.shape_cast %272 : vector<1xf32> to vector<1x1xf32>
    %274 = math.log %273 : vector<1x1xf32>
    %275 = arith.addf %274, %266 : vector<1x1xf32>
    %276 = vector.broadcast %232 : i32 to vector<1x29xi32>
    %277 = arith.cmpi eq, %0, %276 : vector<1x29xi32>
    %cst_91 = arith.constant 0.000000e+00 : f32
    %278 = vector.broadcast %cst_91 : f32 to vector<1x29xf32>
    %279 = arith.select %277, %268, %278 : vector<1x29xi1>, vector<1x29xf32>
    %cst_92 = arith.constant dense<0.000000e+00> : vector<1xf32>
    %280 = vector.multi_reduction <add>, %279, %cst_92 [1] : vector<1x29xf32> to vector<1xf32>
    %281 = vector.shape_cast %280 : vector<1xf32> to vector<1x1xf32>
    %282 = arith.subf %275, %281 : vector<1x1xf32>
    %283 = vector.broadcast %235 : f32 to vector<1x1xf32>
    %284 = arith.mulf %282, %283 : vector<1x1xf32>
    %285 = arith.addf %229, %284 : vector<1x1xf32>
    %c5_i32 = arith.constant 5 : i32
    %c1_i32_93 = arith.constant 1 : i32
    %286 = arith.addi %c5_i32, %c1_i32_93 : i32
    %287 = arith.index_cast %286 : i32 to index
    %288 = memref.load %arg0[%287] : memref<8xi32, #tpu.memory_space<smem>>
    %289 = arith.index_cast %c5_i32 : i32 to index
    %290 = memref.load %arg1[%289] : memref<7xi32, #tpu.memory_space<smem>>
    %291 = arith.sitofp %290 : i32 to f32
    %292 = vector.broadcast %259 : vector<1x1xi32> to vector<1x29xi32>
    %293 = arith.cmpi eq, %0, %292 : vector<1x29xi32>
    %294 = arith.extui %293 : vector<1x29xi1> to vector<1x29xi32>
    %295 = arith.sitofp %294 : vector<1x29xi32> to vector<1x29xf32>
    %296 = arith.truncf %295 : vector<1x29xf32> to vector<1x29xbf16>
    %c0_94 = arith.constant 0 : index
    %c0_95 = arith.constant 0 : index
    %297 = vector.load %arg3[%c0_94, %c0_95] : memref<29x256xbf16, #tpu.memory_space<vmem>>, vector<29x256xbf16>
    %cst_96 = arith.constant dense<0.000000e+00> : vector<1x256xf32>
    %298 = tpu.matmul %296, %297, %cst_96 {dimension_numbers = #tpu.dot_dimension_numbers<[1], [0], [0], [1], [0, 0, 1, 1], [], []>} : vector<1x29xbf16>, vector<29x256xbf16>, vector<1x256xf32> -> vector<1x256xf32>
    %299 = arith.truncf %247 : vector<1x256xf32> to vector<1x256xbf16>
    %c0_97 = arith.constant 0 : index
    %c0_98 = arith.constant 0 : index
    %300 = vector.load %arg4[%c0_97, %c0_98] : memref<256x256xbf16, #tpu.memory_space<vmem>>, vector<256x256xbf16>
    %cst_99 = arith.constant dense<0.000000e+00> : vector<1x256xf32>
    %301 = tpu.matmul %299, %300, %cst_99 {dimension_numbers = #tpu.dot_dimension_numbers<[1], [0], [0], [1], [0, 0, 1, 1], [], []>} : vector<1x256xbf16>, vector<256x256xbf16>, vector<1x256xf32> -> vector<1x256xf32>
    %302 = arith.addf %298, %301 : vector<1x256xf32>
    %303 = math.tanh %302 : vector<1x256xf32>
    %304 = arith.truncf %303 : vector<1x256xf32> to vector<1x256xbf16>
    %c0_100 = arith.constant 0 : index
    %c0_101 = arith.constant 0 : index
    %305 = vector.load %arg5[%c0_100, %c0_101] : memref<256x29xbf16, #tpu.memory_space<vmem>>, vector<256x29xbf16>
    %cst_102 = arith.constant dense<0.000000e+00> : vector<1x29xf32>
    %306 = tpu.matmul %304, %305, %cst_102 {dimension_numbers = #tpu.dot_dimension_numbers<[1], [0], [0], [1], [0, 0, 1, 1], [], []>} : vector<1x256xbf16>, vector<256x29xbf16>, vector<1x29xf32> -> vector<1x29xf32>
    %307 = arith.addf %306, %1 : vector<1x29xf32>
    %cst_103 = arith.constant dense<0xFF800000> : vector<1xf32>
    %308 = vector.multi_reduction <maximumf>, %307, %cst_103 [1] : vector<1x29xf32> to vector<1xf32>
    %309 = vector.shape_cast %308 : vector<1xf32> to vector<1x1xf32>
    %310 = vector.broadcast %309 : vector<1x1xf32> to vector<1x29xf32>
    %311 = arith.cmpf oge, %307, %310 : vector<1x29xf32>
    %c29_i32_104 = arith.constant 29 : i32
    %312 = vector.broadcast %c29_i32_104 : i32 to vector<1x29xi32>
    %313 = arith.select %311, %0, %312 : vector<1x29xi1>, vector<1x29xi32>
    %cst_105 = arith.constant dense<2147483647> : vector<1xi32>
    %314 = vector.multi_reduction <minsi>, %313, %cst_105 [1] : vector<1x29xi32> to vector<1xi32>
    %315 = vector.shape_cast %314 : vector<1xi32> to vector<1x1xi32>
    %316 = vector.broadcast %309 : vector<1x1xf32> to vector<1x29xf32>
    %317 = arith.subf %307, %316 : vector<1x29xf32>
    %318 = math.exp %317 : vector<1x29xf32>
    %cst_106 = arith.constant dense<0.000000e+00> : vector<1xf32>
    %319 = vector.multi_reduction <add>, %318, %cst_106 [1] : vector<1x29xf32> to vector<1xf32>
    %320 = vector.shape_cast %319 : vector<1xf32> to vector<1x1xf32>
    %cst_107 = arith.constant 1.000000e+00 : f32
    %321 = vector.broadcast %cst_107 : f32 to vector<1x1xf32>
    %322 = arith.divf %321, %320 : vector<1x1xf32>
    %323 = vector.broadcast %322 : vector<1x1xf32> to vector<1x29xf32>
    %324 = arith.mulf %318, %323 : vector<1x29xf32>
    %325 = vector.broadcast %322 : vector<1x1xf32> to vector<1x29xf32>
    %326 = arith.subf %324, %325 : vector<1x29xf32>
    %327 = math.exp %326 : vector<1x29xf32>
    %cst_108 = arith.constant dense<0.000000e+00> : vector<1xf32>
    %328 = vector.multi_reduction <add>, %327, %cst_108 [1] : vector<1x29xf32> to vector<1xf32>
    %329 = vector.shape_cast %328 : vector<1xf32> to vector<1x1xf32>
    %330 = math.log %329 : vector<1x1xf32>
    %331 = arith.addf %330, %322 : vector<1x1xf32>
    %332 = vector.broadcast %288 : i32 to vector<1x29xi32>
    %333 = arith.cmpi eq, %0, %332 : vector<1x29xi32>
    %cst_109 = arith.constant 0.000000e+00 : f32
    %334 = vector.broadcast %cst_109 : f32 to vector<1x29xf32>
    %335 = arith.select %333, %324, %334 : vector<1x29xi1>, vector<1x29xf32>
    %cst_110 = arith.constant dense<0.000000e+00> : vector<1xf32>
    %336 = vector.multi_reduction <add>, %335, %cst_110 [1] : vector<1x29xf32> to vector<1xf32>
    %337 = vector.shape_cast %336 : vector<1xf32> to vector<1x1xf32>
    %338 = arith.subf %331, %337 : vector<1x1xf32>
    %339 = vector.broadcast %291 : f32 to vector<1x1xf32>
    %340 = arith.mulf %338, %339 : vector<1x1xf32>
    %341 = arith.addf %285, %340 : vector<1x1xf32>
    %c6_i32 = arith.constant 6 : i32
    %c1_i32_111 = arith.constant 1 : i32
    %342 = arith.addi %c6_i32, %c1_i32_111 : i32
    %343 = arith.index_cast %342 : i32 to index
    %344 = memref.load %arg0[%343] : memref<8xi32, #tpu.memory_space<smem>>
    %345 = arith.index_cast %c6_i32 : i32 to index
    %346 = memref.load %arg1[%345] : memref<7xi32, #tpu.memory_space<smem>>
    %347 = arith.sitofp %346 : i32 to f32
    %348 = vector.broadcast %315 : vector<1x1xi32> to vector<1x29xi32>
    %349 = arith.cmpi eq, %0, %348 : vector<1x29xi32>
    %350 = arith.extui %349 : vector<1x29xi1> to vector<1x29xi32>
    %351 = arith.sitofp %350 : vector<1x29xi32> to vector<1x29xf32>
    %352 = arith.truncf %351 : vector<1x29xf32> to vector<1x29xbf16>
    %c0_112 = arith.constant 0 : index
    %c0_113 = arith.constant 0 : index
    %353 = vector.load %arg3[%c0_112, %c0_113] : memref<29x256xbf16, #tpu.memory_space<vmem>>, vector<29x256xbf16>
    %cst_114 = arith.constant dense<0.000000e+00> : vector<1x256xf32>
    %354 = tpu.matmul %352, %353, %cst_114 {dimension_numbers = #tpu.dot_dimension_numbers<[1], [0], [0], [1], [0, 0, 1, 1], [], []>} : vector<1x29xbf16>, vector<29x256xbf16>, vector<1x256xf32> -> vector<1x256xf32>
    %355 = arith.truncf %303 : vector<1x256xf32> to vector<1x256xbf16>
    %c0_115 = arith.constant 0 : index
    %c0_116 = arith.constant 0 : index
    %356 = vector.load %arg4[%c0_115, %c0_116] : memref<256x256xbf16, #tpu.memory_space<vmem>>, vector<256x256xbf16>
    %cst_117 = arith.constant dense<0.000000e+00> : vector<1x256xf32>
    %357 = tpu.matmul %355, %356, %cst_117 {dimension_numbers = #tpu.dot_dimension_numbers<[1], [0], [0], [1], [0, 0, 1, 1], [], []>} : vector<1x256xbf16>, vector<256x256xbf16>, vector<1x256xf32> -> vector<1x256xf32>
    %358 = arith.addf %354, %357 : vector<1x256xf32>
    %359 = math.tanh %358 : vector<1x256xf32>
    %360 = arith.truncf %359 : vector<1x256xf32> to vector<1x256xbf16>
    %c0_118 = arith.constant 0 : index
    %c0_119 = arith.constant 0 : index
    %361 = vector.load %arg5[%c0_118, %c0_119] : memref<256x29xbf16, #tpu.memory_space<vmem>>, vector<256x29xbf16>
    %cst_120 = arith.constant dense<0.000000e+00> : vector<1x29xf32>
    %362 = tpu.matmul %360, %361, %cst_120 {dimension_numbers = #tpu.dot_dimension_numbers<[1], [0], [0], [1], [0, 0, 1, 1], [], []>} : vector<1x256xbf16>, vector<256x29xbf16>, vector<1x29xf32> -> vector<1x29xf32>
    %363 = arith.addf %362, %1 : vector<1x29xf32>
    %cst_121 = arith.constant dense<0xFF800000> : vector<1xf32>
    %364 = vector.multi_reduction <maximumf>, %363, %cst_121 [1] : vector<1x29xf32> to vector<1xf32>
    %365 = vector.shape_cast %364 : vector<1xf32> to vector<1x1xf32>
    %366 = vector.broadcast %365 : vector<1x1xf32> to vector<1x29xf32>
    %367 = arith.cmpf oge, %363, %366 : vector<1x29xf32>
    %c29_i32_122 = arith.constant 29 : i32
    %368 = vector.broadcast %c29_i32_122 : i32 to vector<1x29xi32>
    %369 = arith.select %367, %0, %368 : vector<1x29xi1>, vector<1x29xi32>
    %cst_123 = arith.constant dense<2147483647> : vector<1xi32>
    %370 = vector.multi_reduction <minsi>, %369, %cst_123 [1] : vector<1x29xi32> to vector<1xi32>
    %371 = vector.shape_cast %370 : vector<1xi32> to vector<1x1xi32>
    %372 = vector.broadcast %365 : vector<1x1xf32> to vector<1x29xf32>
    %373 = arith.subf %363, %372 : vector<1x29xf32>
    %374 = math.exp %373 : vector<1x29xf32>
    %cst_124 = arith.constant dense<0.000000e+00> : vector<1xf32>
    %375 = vector.multi_reduction <add>, %374, %cst_124 [1] : vector<1x29xf32> to vector<1xf32>
    %376 = vector.shape_cast %375 : vector<1xf32> to vector<1x1xf32>
    %cst_125 = arith.constant 1.000000e+00 : f32
    %377 = vector.broadcast %cst_125 : f32 to vector<1x1xf32>
    %378 = arith.divf %377, %376 : vector<1x1xf32>
    %379 = vector.broadcast %378 : vector<1x1xf32> to vector<1x29xf32>
    %380 = arith.mulf %374, %379 : vector<1x29xf32>
    %381 = vector.broadcast %378 : vector<1x1xf32> to vector<1x29xf32>
    %382 = arith.subf %380, %381 : vector<1x29xf32>
    %383 = math.exp %382 : vector<1x29xf32>
    %cst_126 = arith.constant dense<0.000000e+00> : vector<1xf32>
    %384 = vector.multi_reduction <add>, %383, %cst_126 [1] : vector<1x29xf32> to vector<1xf32>
    %385 = vector.shape_cast %384 : vector<1xf32> to vector<1x1xf32>
    %386 = math.log %385 : vector<1x1xf32>
    %387 = arith.addf %386, %378 : vector<1x1xf32>
    %388 = vector.broadcast %344 : i32 to vector<1x29xi32>
    %389 = arith.cmpi eq, %0, %388 : vector<1x29xi32>
    %cst_127 = arith.constant 0.000000e+00 : f32
    %390 = vector.broadcast %cst_127 : f32 to vector<1x29xf32>
    %391 = arith.select %389, %380, %390 : vector<1x29xi1>, vector<1x29xf32>
    %cst_128 = arith.constant dense<0.000000e+00> : vector<1xf32>
    %392 = vector.multi_reduction <add>, %391, %cst_128 [1] : vector<1x29xf32> to vector<1xf32>
    %393 = vector.shape_cast %392 : vector<1xf32> to vector<1x1xf32>
    %394 = arith.subf %387, %393 : vector<1x1xf32>
    %395 = vector.broadcast %347 : f32 to vector<1x1xf32>
    %396 = arith.mulf %394, %395 : vector<1x1xf32>
    %397 = arith.addf %341, %396 : vector<1x1xf32>
    %c7_i32 = arith.constant 7 : i32
    %c0_129 = arith.constant 0 : index
    %c0_130 = arith.constant 0 : index
    %398 = vector.load %arg7[%c0_129, %c0_130] : memref<1x1xf32, #tpu.memory_space<vmem>>, vector<1x1xf32>
    tpu.vector_store %arg7[%c0_129, %c0_130], %397 {strides = array<i32>} : memref<1x1xf32, #tpu.memory_space<vmem>>, vector<1x1xf32>,
    return
  }
}

</mosaic_0001>

<bundles_post_ra>
// kernel: tpu_custom_call.1
= control target key start
LH: loop header
LB: loop body
LE: loop exit
PB: predicated region body
PF: predicated region fallthrough
CT: control target
= control target key end

     0   :  { %12 = vsyncpa [#allocation5], 0  ;;  %s3107_s0 = inlined_call_operand.vmem [shape: s32[8], index: 0, kind: input, shape index: {}]   ;;  %s3108_s1 = inlined_call_operand.vmem [shape: s32[7], index: 1, kind: input, shape index: {}]   ;;  %s3109_s2 = inlined_call_operand.vmem [shape: f32[1,256], index: 2, kind: input, shape index: {}]   ;;  %s3110_s3 = inlined_call_operand.vmem [shape: bf16[29,256], index: 3, kind: input, shape index: {}]   ;;  %s3111_s4 = inlined_call_operand.hbm [shape: bf16[256,256], index: 4, kind: input, shape index: {}]   ;;  %s3112_s5 = inlined_call_operand.vmem [shape: bf16[256,29], index: 5, kind: input, shape index: {}]   ;;  %s3113_s6 = inlined_call_operand.vmem [shape: f32[1,29], index: 6, kind: input, shape index: {}]   ;;  %s3114_s7 = inlined_call_operand.hbm [shape: f32[1,1], index: 7, kind: output, shape index: {}]  }
   0x1   :  { %13 = vsyncpa [#allocation7], 0 }
   0x2   :  { %14 = vsyncpa [#allocation3], 0 }
   0x3   :  { %15 = vsyncpa [#allocation4], 0  ;;  %s21_s26 = sshll.u32 %s3107_s0, 4  ;;  %s30_s29 = sshll.u32 %s3108_s1, 4  ;;  %s22_s26 = int_to_ptr.vmem [resolvable:$true] %s21_s26  ;;  %s31_s29 = int_to_ptr.vmem [resolvable:$true] %s30_s29 }
   0x4   :  { %s2176_s30 = smov [#allocation2]   ;;  %s2177_s8 = smov [#allocation6]  }
   0x5   :  { %24 = dma.vmem_to_smem %s22_s26, 16, %s2176_s30, [#allocation5]  }
   0x6   :  { %33 = dma.vmem_to_smem %s31_s29, 16, %s2177_s8, [#allocation7]  }
   0x7   :  { %s42_s11 = sshll.u32 %s3111_s4, 4  ;;  %s2178_s12 = smov [#allocation8]   ;;  %s43_s11 = int_to_ptr.hbm [resolvable:$true] %s42_s11 }
   0x8   :  { %s44_s13 = sshll.u32 %s2178_s12, 4  ;;  %s2179_s14 = smov 128   ;;  %s45_s13 = int_to_ptr.vmem [resolvable:$true] %s44_s13 }
   0x9   :  { %s2180_s0 = smov 8  }
   0xa   :  { %50 = dma.hbm_to_vmem [thread:$0]  %s43_s11, 4096, %s45_s13, [#allocation3], %s2179_s14, %s2179_s14, %s2180_s0  }
   0xb   :  { %2168 = dma.done.wait [#allocation5], 16  }
   0xc   :  { %2169 = vsyncadd [#allocation5], 4294967280 }
   0xd   :  { %2170 = dma.done.wait [#allocation7], 16  }
   0xe   :  { %2171 = vsyncadd [#allocation7], 4294967280 }
   0xf   :  { %2172 = dma.done.wait [#allocation3], 4096  }
  0x10   :  { %2173 = vsyncadd [#allocation3], 4294963200 }
  0x11   :  { %67 = sfence }
  0x12   :  { %v1753_v0 = vld [vmem:[#allocation8 + $0x70] sm:$0xf]  ;;  %v1954_v1 = vld [vmem:[#allocation8 + $0x74] sm:$0xf0]  ;;  %v1953_v5 = vld [vmem:[#allocation8 + $0x74] sm:$0xf] }
  0x13   :  { %v1817_v2 = vld [vmem:[#allocation8 + $0xf0] sm:$0xf]  ;;  %v2233_v3 = vor.u32 %v1954_v1, %v1753_v0  ;;  %v1970_v4 = vld [vmem:[#allocation8 + $0xf4] sm:$0xf0]  ;;  %v1755_v6 = vld [vmem:[#allocation8 + $0x78] sm:$0xf0] }
  0x14   :  { %v2235_v7 = vor.u32 %v1970_v4, %v1817_v2  ;;  %v2237_v8 = vor.u32 %v1953_v5, %v1755_v6  ;;  %v1969_v9 = vld [vmem:[#allocation8 + $0xf4] sm:$0xf]  ;;  %v1819_v10 = vld [vmem:[#allocation8 + $0xf8] sm:$0xf0]  ;;  %v1745_v11 = vld [vmem:[#allocation8 + $0x60] sm:$0xf] }
  0x15   :  { %285 = vmatpush.bf16.msra.mxu0 %v2233_v3  ;;  %v2240_v12 = vor.u32 %v1969_v9, %v1819_v10  ;;  %v1952_v13 = vld [vmem:[#allocation8 + $0x64] sm:$0xf0]  ;;  %v1809_v14 = vld [vmem:[#allocation8 + $0xe0] sm:$0xf]  ;;  %v1951_v18 = vld [vmem:[#allocation8 + $0x64] sm:$0xf] }
  0x16   :  { %v1968_v15 = vld [vmem:[#allocation8 + $0xe4] sm:$0xf0]  ;;  %298 = vmatpush.bf16.msra.mxu1 %v2235_v7  ;;  %311 = vmatpush.bf16.msra.mxu2 %v2237_v8  ;;  %v2244_v16 = vor.u32 %v1952_v13, %v1745_v11  ;;  %v1747_v19 = vld [vmem:[#allocation8 + $0x68] sm:$0xf0]  ;;  %v1967_v20 = vld [vmem:[#allocation8 + $0xe4] sm:$0xf] }
  0x17   :  { %v2246_v17 = vor.u32 %v1968_v15, %v1809_v14  ;;  %324 = vmatpush.bf16.msra.mxu3 %v2240_v12  ;;  %v2249_v21 = vor.u32 %v1951_v18, %v1747_v19  ;;  %v1811_v22 = vld [vmem:[#allocation8 + $0xe8] sm:$0xf0]  ;;  %v1737_v23 = vld [vmem:[#allocation8 + $0x50] sm:$0xf]  ;;  %v1950_v24 = vld [vmem:[#allocation8 + $0x54] sm:$0xf0] }
  0x18   :  { %v2251_v25 = vor.u32 %v1967_v20, %v1811_v22  ;;  %v1801_v26 = vld [vmem:[#allocation8 + $0xd0] sm:$0xf]  ;;  %v1966_v27 = vld [vmem:[#allocation8 + $0xd4] sm:$0xf0]  ;;  %v1949_v28 = vld [vmem:[#allocation8 + $0x54] sm:$0xf]  ;;  %v2254_v29 = vor.u32 %v1950_v24, %v1737_v23 }
  0x19   :  { %286 = vmatpush.bf16.msra.mxu0 %v2244_v16  ;;  %v1739_v30 = vld [vmem:[#allocation8 + $0x58] sm:$0xf0]  ;;  %v1965_v31 = vld [vmem:[#allocation8 + $0xd4] sm:$0xf]  ;;  %v2258_v33 = vor.u32 %v1966_v27, %v1801_v26  ;;  %v1729_v35 = vld [vmem:[#allocation8 + $0x40] sm:$0xf] }
  0x1a   :  { %v1803_v32 = vld [vmem:[#allocation8 + $0xd8] sm:$0xf0]  ;;  %299 = vmatpush.bf16.msra.mxu1 %v2246_v17  ;;  %312 = vmatpush.bf16.msra.mxu2 %v2249_v21  ;;  %v2260_v34 = vor.u32 %v1949_v28, %v1739_v30  ;;  %v1948_v36 = vld [vmem:[#allocation8 + $0x44] sm:$0xf0]  ;;  %v1793_v37 = vld [vmem:[#allocation8 + $0xc0] sm:$0xf] }
  0x1b   :  { %325 = vmatpush.bf16.msra.mxu3 %v2251_v25  ;;  %v2263_v38 = vor.u32 %v1965_v31, %v1803_v32  ;;  %v1964_v39 = vld [vmem:[#allocation8 + $0xc4] sm:$0xf0]  ;;  %v1947_v40 = vld [vmem:[#allocation8 + $0x44] sm:$0xf]  ;;  %v1731_v41 = vld [vmem:[#allocation8 + $0x48] sm:$0xf0]  ;;  %v2266_v44 = vor.u32 %v1948_v36, %v1729_v35 }
  0x1c   :  { %v1963_v42 = vld [vmem:[#allocation8 + $0xc4] sm:$0xf]  ;;  %v1795_v43 = vld [vmem:[#allocation8 + $0xc8] sm:$0xf0]  ;;  %v2270_v45 = vor.u32 %v1964_v39, %v1793_v37  ;;  %v2272_v46 = vor.u32 %v1947_v40, %v1731_v41  ;;  %v1721_v47 = vld [vmem:[#allocation8 + $0x30] sm:$0xf] }
  0x1d   :  { %287 = vmatpush.bf16.msra.mxu0 %v2254_v29  ;;  %v1946_v48 = vld [vmem:[#allocation8 + $0x34] sm:$0xf0]  ;;  %v1785_v49 = vld [vmem:[#allocation8 + $0xb0] sm:$0xf]  ;;  %v2275_v50 = vor.u32 %v1963_v42, %v1795_v43  ;;  %v1945_v52 = vld [vmem:[#allocation8 + $0x34] sm:$0xf] }
  0x1e   :  { %300 = vmatpush.bf16.msra.mxu1 %v2258_v33  ;;  %313 = vmatpush.bf16.msra.mxu2 %v2260_v34  ;;  %v1962_v51 = vld [vmem:[#allocation8 + $0xb4] sm:$0xf0]  ;;  %v1723_v53 = vld [vmem:[#allocation8 + $0x38] sm:$0xf0]  ;;  %v1961_v54 = vld [vmem:[#allocation8 + $0xb4] sm:$0xf]  ;;  %v2278_v56 = vor.u32 %v1946_v48, %v1721_v47 }
  0x1f   :  { %326 = vmatpush.bf16.msra.mxu3 %v2263_v38  ;;  %3153 = vst [vmem:[#allocation14_spill] sm:$0xff] %v2275_v50  ;;  %v1787_v55 = vld [vmem:[#allocation8 + $0xb8] sm:$0xf0]  ;;  %v2282_v57 = vor.u32 %v1962_v51, %v1785_v49  ;;  %v2284_v58 = vor.u32 %v1945_v52, %v1723_v53  ;;  %v1713_v59 = vld [vmem:[#allocation8 + $0x20] sm:$0xf]  ;;  %vm359_vm0 = vcmask 1045504  }
  0x20   :  { %v1944_v60 = vld [vmem:[#allocation8 + $0x24] sm:$0xf0]  ;;  %v1777_v61 = vld [vmem:[#allocation8 + $0xa0] sm:$0xf]  ;;  %v2287_v62 = vor.u32 %v1961_v54, %v1787_v55  ;;  %v1943_v0 = vld [vmem:[#allocation8 + $0x24] sm:$0xf] }
  0x21   :  { %288 = vmatpush.bf16.msra.mxu0 %v2266_v44  ;;  %3154 = vst [vmem:[#allocation15_spill] sm:$0xff] %v2284_v58  ;;  %v1960_v63 = vld [vmem:[#allocation8 + $0xa4] sm:$0xf0]  ;;  %v1715_v1 = vld [vmem:[#allocation8 + $0x28] sm:$0xf0]  ;;  %v2290_v5 = vor.u32 %v1944_v60, %v1713_v59  ;;  %vm360_vm1 = vcmask 1046528  }
  0x22   :  { %301 = vmatpush.bf16.msra.mxu1 %v2270_v45  ;;  %314 = vmatpush.bf16.msra.mxu2 %v2272_v46  ;;  %3155 = vst [vmem:[#allocation16_spill] sm:$0xff] %v2287_v62  ;;  %v1959_v2 = vld [vmem:[#allocation8 + $0xa4] sm:$0xf]  ;;  %v1779_v4 = vld [vmem:[#allocation8 + $0xa8] sm:$0xf0]  ;;  %v2294_v11 = vor.u32 %v1960_v63, %v1777_v61  ;;  %v2296_v13 = vor.u32 %v1943_v0, %v1715_v1  ;;  %v2181_v39 = vmov 65535  }
  0x23   :  { %327 = vmatpush.bf16.msra.mxu3 %v2275_v50  ;;  %v1705_v6 = vld [vmem:[#allocation8 + $0x10] sm:$0xf]  ;;  %v1942_v9 = vld [vmem:[#allocation8 + $0x14] sm:$0xf0]  ;;  %v1941_v15 = vld [vmem:[#allocation8 + $0x14] sm:$0xf]  ;;  %v2299_v19 = vor.u32 %v1959_v2, %v1779_v4 }
  0x24   :  { %v1769_v10 = vld [vmem:[#allocation8 + $0x90] sm:$0xf]  ;;  %3156 = vst [vmem:[#allocation17_spill] sm:$0xff] %v2296_v13  ;;  %v1958_v14 = vld [vmem:[#allocation8 + $0x94] sm:$0xf0]  ;;  %v2311_v28 = vor.u32 %v1942_v9, %v1705_v6  ;;  %v361_v40 = vsel %vm359_vm0, 4294967295, %v2181_v39 }
  0x25   :  { %289 = vmatpush.bf16.msra.mxu0 %v2278_v56  ;;  %v1707_v18 = vld [vmem:[#allocation8 + $0x18] sm:$0xf0]  ;;  %3157 = vst [vmem:[#allocation18_spill] sm:$0xff] %v2299_v19  ;;  %v1957_v20 = vld [vmem:[#allocation8 + $0x94] sm:$0xf]  ;;  %v2321_v32 = vor.u32 %v1958_v14, %v1769_v10  ;;  %v362_v53 = vsel %vm360_vm1, %v361_v40, 0 }
  0x26   :  { %302 = vmatpush.bf16.msra.mxu1 %v2282_v57  ;;  %315 = vmatpush.bf16.msra.mxu2 %v2284_v58  ;;  %v1771_v22 = vld [vmem:[#allocation8 + $0x98] sm:$0xf0]  ;;  %v73_v23 = vld [vmem:[%s3109_s2] sm:$0x3]  ;;  %v1833_v26 = vld [vmem:[%s3110_s3 + $0x10] sm:$0xf]  ;;  %v2323_v35 = vor.u32 %v1941_v15, %v1707_v18  ;;  %v69_v15 = vlaneseq }
  0x27   :  { %328 = vmatpush.bf16.msra.mxu3 %v2287_v62  ;;  %v1697_v24 = vld [vmem:[#allocation8] sm:$0xf]  ;;  %v1938_v27 = vld [vmem:[%s3110_s3 + $0x14] sm:$0x70]  ;;  %v1937_v30 = vld [vmem:[%s3110_s3 + $0x14] sm:$0xf]  ;;  %v2326_v41 = vor.u32 %v1957_v20, %v1771_v22 }
  0x28   :  { %v1835_v31 = vld [vmem:[%s3110_s3 + $0x18] sm:$0x70]  ;;  %3158 = vst [vmem:[#allocation19_spill] sm:$0xff] %v2323_v35  ;;  %v1940_v36 = vld [vmem:[#allocation8 + $0x4] sm:$0xf0]  ;;  %v1834_v48 = vor.u32 %v1938_v27, %v1833_v26  ;;  %v87_v52 = vperm.slane %v73_v23, 0 }
  0x29   :  { %290 = vmatpush.bf16.msra.mxu0 %v2290_v5  ;;  %v1761_v37 = vld [vmem:[#allocation8 + $0x80] sm:$0xf]  ;;  %3159 = vst [vmem:[#allocation20_spill] sm:$0xff] %v2326_v41  ;;  %v1956_v42 = vld [vmem:[#allocation8 + $0x84] sm:$0xf0]  ;;  %v1838_v54 = vor.u32 %v1937_v30, %v1835_v31  ;;  %v2330_v55 = vor.u32 %v1940_v36, %v1697_v24  ;;  %v88_v59 = vperm.slane %v73_v23, 1 }
  0x2a   :  { %303 = vmatpush.bf16.msra.mxu1 %v2294_v11  ;;  %316 = vmatpush.bf16.msra.mxu2 %v2296_v13  ;;  %v1939_v43 = vld [vmem:[#allocation8 + $0x4] sm:$0xf]  ;;  %v1699_v47 = vld [vmem:[#allocation8 + $0x8] sm:$0xf0]  ;;  %v2334_v60 = vor.u32 %v1956_v42, %v1761_v37  ;;  %v2341_v0 = vand.u32 %v1834_v48, %v362_v53  ;;  %s2343_s22 = sld [smem:[#allocation2]]  ;;  %v91_v1 = vpack.c.bf16 %v87_v52, %v87_v52  ;;  %v2365_v18 = vld [vmem:[%s3112_s5 + $0x38] sm:$0xff] }
  0x2b   :  { %329 = vmatpush.bf16.msra.mxu3 %v2299_v19  ;;  %v1955_v49 = vld [vmem:[#allocation8 + $0x84] sm:$0xf]  ;;  %v1763_v51 = vld [vmem:[#allocation8 + $0x88] sm:$0xf0]  ;;  %3160 = vst [vmem:[#allocation21_spill] sm:$0xff] %v2330_v55  ;;  %v2336_v61 = vor.u32 %v1939_v43, %v1699_v47  ;;  %v2345_v2 = vand.u32 %v1838_v54, %v362_v53  ;;  %v92_v9 = vpack.c.bf16 %v88_v59, %v88_v59  ;;  %v2374_v22 = vld [vmem:[%s3112_s5 + $0x78] sm:$0xff] }
  0x2c   :  { %3161 = vst [vmem:[#allocation22_spill] sm:$0xff] %v2334_v60  ;;  %v2339_v63 = vor.u32 %v1955_v49, %v1763_v51  ;;  %v1825_v4 = vld [vmem:[%s3110_s3] sm:$0xf]  ;;  %v1936_v6 = vld [vmem:[%s3110_s3 + $0x4] sm:$0xf0]  ;;  %v2379_v24 = vand.u32 127, %v69_v15 }
  0x2d   :  { %291 = vmatpush.bf16.msra.mxu0 %v2311_v28  ;;  %3162 = vst [vmem:[#allocation23_spill] sm:$0xff] %v2341_v0  ;;  %v1935_v10 = vld [vmem:[%s3110_s3 + $0x4] sm:$0xf]  ;;  %v1827_v14 = vld [vmem:[%s3110_s3 + $0x8] sm:$0xf0]  ;;  %v2369_v20 = vor.u32 %v1936_v6, %v1825_v4  ;;  %v2385_v26 = vld [vmem:[%s3112_s5 + $0x30] sm:$0xff] }
  0x2e   :  { %304 = vmatpush.bf16.msra.mxu1 %v2321_v32  ;;  %317 = vmatpush.bf16.msra.mxu2 %v2323_v35  ;;  %3163 = vst [vmem:[#allocation24_spill] sm:$0xff] %v2345_v2  ;;  %v2377_v23 = vor.u32 %v1935_v10, %v1827_v14  ;;  %v2393_v30 = vld [vmem:[%s3112_s5 + $0x70] sm:$0xff]  ;;  %v2403_v31 = vld [vmem:[%s3112_s5 + $0x28] sm:$0xff]  ;;  %v3115_v37 = vmov 0.0   ;;  %v2418_v40 = vld [vmem:[%s3112_s5 + $0x20] sm:$0xff]  ;;  %vm355_vm3 = vcmask 236544  }
  0x2f   :  { %330 = vmatpush.bf16.msra.mxu3 %v2326_v41  ;;  %3164 = vst [vmem:[#allocation25_spill] sm:$0xff] %v2369_v20  ;;  %v2409_v36 = vld [vmem:[%s3112_s5 + $0x68] sm:$0xff]  ;;  %v2424_v42 = vld [vmem:[%s3112_s5 + $0x60] sm:$0xff]  ;;  %v2449_v47 = vld [vmem:[%s3112_s5 + $0x18] sm:$0xff]  ;;  %vm553_vm4 = vcmask 229376   ;;  %s1915_s15 = sld [smem:[#allocation2 + $0x4]] }
  0x30   :  { %3165 = vst [vmem:[#allocation26_spill] sm:$0xff] %v2377_v23  ;;  %v77_v27 = vstv %s2343_s22  ;;  %v2454_v48 = vld [vmem:[%s3112_s5 + $0x58] sm:$0xff]  ;;  %v2461_v49 = vld [vmem:[%s3112_s5 + $0x10] sm:$0xff]  ;;  %v2473_v52 = vld [vmem:[%s3112_s5 + $0x8] sm:$0xff]  ;;  %s1905_s16 = sld [smem:[#allocation2 + $0x2]]  ;;  %s2183_s11 = smov [#allocation9]  }
  0x31   :  { %292 = vmatpush.bf16.msra.mxu0 %v2330_v55  ;;  %vm78_vm2 = vcmp.eq.s32.totalorder %v2379_v24, %v77_v27  ;;  %v2466_v51 = vld [vmem:[%s3112_s5 + $0x50] sm:$0xff]  ;;  %v2478_v53 = vld [vmem:[%s3112_s5 + $0x48] sm:$0xff]  ;;  %v2485_v54 = vld [vmem:[%s3112_s5] sm:$0xff]  ;;  %s1920_s17 = sld [smem:[#allocation2 + $0x5]]  ;;  %s1679_s3 = sshll.u32 %s2183_s11, 4  ;;  %s1680_s3 = int_to_ptr.vmem [resolvable:$true] %s1679_s3 }
  0x32   :  { %305 = vmatpush.bf16.msra.mxu1 %v2334_v60  ;;  %318 = vmatpush.bf16.msra.mxu2 %v2336_v61  ;;  %v1694_v39 = vsel %vm78_vm2, 1.0, %v3115_v37  ;;  %3166 = vst [vmem:[#allocation27_spill] sm:$0xff] %v2485_v54  ;;  %v2490_v59 = vld [vmem:[%s3112_s5 + $0x40] sm:$0xff]  ;;  %s1930_s18 = sld [smem:[#allocation2 + $0x7]]  ;;  %s1681_s14 = sshll.u32 %s3114_s7, 4  ;;  %s1682_s14 = int_to_ptr.hbm [resolvable:$true] %s1681_s14 }
  0x33   :  { %331 = vmatpush.bf16.msra.mxu3 %v2339_v63  ;;  %v81_v43 = vpack.c.bf16 %v1694_v39, %v1694_v39  ;;  %3167 = vst [vmem:[#allocation28_spill] sm:$0xff] %v2490_v59  ;;  %s1910_s19 = sld [smem:[#allocation2 + $0x3]] }
  0x34   :  { %293 = vmatmul.bf16.vlgmr.msra.gmra.mxu0 %v91_v1  ;;  %s1925_s20 = sld [smem:[#allocation2 + $0x6]] }
  0x35   :  { %375 = vmatpush.bf16.msrb.mxu0 %v2341_v0  ;;  %306 = vmatmul.bf16.vlgmr.msra.gmra.mxu1 %v92_v9  ;;  %s1906_s2 = sld [smem:[#allocation6 + $0x1]] }
  0x36   :  { %388 = vmatpush.bf16.msrb.mxu1 %v2345_v2  ;;  %319 = vmatmul.bf16.vlgmr.msra.gmra.mxu2 %v91_v1  ;;  %s75_s21 = sld [smem:[#allocation6]] }
  0x37   :  { %332 = vmatmul.bf16.vlgmr.msra.gmra.mxu3 %v92_v9  ;;  %527 = vmatpush.bf16.msrb.mxu2 %v2365_v18  ;;  %s3082_s22 = sld [smem:[#allocation6 + $0x2]] }
  0x38   :  { %540 = vmatpush.bf16.msrb.mxu3 %v2374_v22  ;;  %s3084_s23 = sld [smem:[#allocation6 + $0x3]] }
  0x39   :  { %376 = vmatpush.bf16.msrb.mxu0 %v2369_v20  ;;  %s3087_s26 = sld [smem:[#allocation6 + $0x4]] }
  0x3a   :  { %389 = vmatpush.bf16.msrb.mxu1 %v2377_v23  ;;  %s3091_s28 = sld [smem:[#allocation6 + $0x5]] }
  0x3b   :  { %528 = vmatpush.bf16.msrb.mxu2 %v2385_v26  ;;  %s617_s24 = scvt.s32.f32 %s1906_s2  ;;  %s3094_s30 = sld [smem:[#allocation6 + $0x6]] }
  0x3c   :  { %541 = vmatpush.bf16.msrb.mxu3 %v2393_v30  ;;  %s76_s25 = scvt.s32.f32 %s75_s21 }
  0x3d   :  { %622 = vmatpush.bf16.msra.mxu0 %v2233_v3  ;;  %s796_s27 = scvt.s32.f32 %s3082_s22 }
  0x3e   :  { %635 = vmatpush.bf16.msra.mxu1 %v2235_v7  ;;  %s975_s29 = scvt.s32.f32 %s3084_s23 }
  0x3f   :  { %529 = vmatpush.bf16.msrb.mxu2 %v2403_v31  ;;  %s1154_s8 = scvt.s32.f32 %s3087_s26 }
  0x40   :  { %542 = vmatpush.bf16.msrb.mxu3 %v2409_v36  ;;  %s1333_s9 = scvt.s32.f32 %s3091_s28 }
  0x41   :  { %623 = vmatpush.bf16.msra.mxu0 %v2244_v16  ;;  %s1512_s10 = scvt.s32.f32 %s3094_s30 }
  0x42   :  { %636 = vmatpush.bf16.msra.mxu1 %v2246_v17 }
  0x43   :  { %530 = vmatpush.bf16.msrb.mxu2 %v2418_v40 }
  0x44   :  { %543 = vmatpush.bf16.msrb.mxu3 %v2424_v42  ;;  %1839 = vmatmul.msk.bf16.vlgmr.msrb.gmra.mxu0 %vm355_vm3, %v81_v43 }
  0x45   :  { %624 = vmatpush.bf16.msra.mxu0 %v2254_v29  ;;  %1840 = vmatmul.msk.bf16.vlgmr.msrb.gmra.mxu1 %vm355_vm3, %v81_v43 }
  0x46   :  { %637 = vmatpush.bf16.msra.mxu1 %v2258_v33 }
  0x47   :  { %531 = vmatpush.bf16.msrb.mxu2 %v2449_v47 }
  0x48   :  { %544 = vmatpush.bf16.msrb.mxu3 %v2454_v48 }
  0x49   :  { %625 = vmatpush.bf16.msra.mxu0 %v2266_v44 }
  0x4a   :  { %638 = vmatpush.bf16.msra.mxu1 %v2270_v45 }
  0x4b   :  { %532 = vmatpush.bf16.msrb.mxu2 %v2461_v49 }
  0x4c   :  { %545 = vmatpush.bf16.msrb.mxu3 %v2466_v51 }
  0x4d   :  { %626 = vmatpush.bf16.msra.mxu0 %v2278_v56 }
  0x4e   :  { %639 = vmatpush.bf16.msra.mxu1 %v2282_v57 }
  0x4f   :  { %533 = vmatpush.bf16.msrb.mxu2 %v2473_v52 }
  0x50   :  { %546 = vmatpush.bf16.msrb.mxu3 %v2478_v53 }
  0x51   :  { %627 = vmatpush.bf16.msra.mxu0 %v2290_v5 }
  0x52   :  { %640 = vmatpush.bf16.msra.mxu1 %v2294_v11 }
  0x53   :  { %534 = vmatpush.bf16.msrb.mxu2 %v2485_v54 }
  0x54   :  { %547 = vmatpush.bf16.msrb.mxu3 %v2490_v59 }
  0x55   :  { %628 = vmatpush.bf16.msra.mxu0 %v2311_v28 }
  0x56   :  { %641 = vmatpush.bf16.msra.mxu1 %v2321_v32 }
  0x57   :  { %648 = vmatpush.bf16.msra.mxu2 %v2237_v8 }
  0x58   :  { %661 = vmatpush.bf16.msra.mxu3 %v2240_v12 }
  0x59   :  { %629 = vmatpush.bf16.msra.mxu0 %v2330_v55 }
  0x5a   :  { %642 = vmatpush.bf16.msra.mxu1 %v2334_v60 }
  0x5b   :  { %649 = vmatpush.bf16.msra.mxu2 %v2249_v21 }
  0x5c   :  { %662 = vmatpush.bf16.msra.mxu3 %v2251_v25 }
  0x5d   :  { %683 = vmatpush.bf16.msrb.mxu0 %v2341_v0 }
  0x5e   :  { %696 = vmatpush.bf16.msrb.mxu1 %v2345_v2 }
  0x5f   :  { %650 = vmatpush.bf16.msra.mxu2 %v2260_v34 }
  0x60   :  { %663 = vmatpush.bf16.msra.mxu3 %v2263_v38 }
  0x61   :  { %684 = vmatpush.bf16.msrb.mxu0 %v2369_v20 }
  0x62   :  { %697 = vmatpush.bf16.msrb.mxu1 %v2377_v23 }
  0x63   :  { %651 = vmatpush.bf16.msra.mxu2 %v2272_v46 }
  0x64   :  { %664 = vmatpush.bf16.msra.mxu3 %v2275_v50 }
  0x67   :  { %652 = vmatpush.bf16.msra.mxu2 %v2284_v58 }
  0x68   :  { %665 = vmatpush.bf16.msra.mxu3 %v2287_v62 }
  0x6b   :  { %653 = vmatpush.bf16.msra.mxu2 %v2296_v13 }
  0x6c   :  { %666 = vmatpush.bf16.msra.mxu3 %v2299_v19 }
  0x6f   :  { %654 = vmatpush.bf16.msra.mxu2 %v2323_v35 }
  0x70   :  { %667 = vmatpush.bf16.msra.mxu3 %v2326_v41 }
  0x73   :  { %655 = vmatpush.bf16.msra.mxu2 %v2336_v61 }
  0x74   :  { %668 = vmatpush.bf16.msra.mxu3 %v2339_v63 }
  0xb1   :  { %v294_v1 = vpop.f32.mrf.mxu0 }
  0xb2   :  { %v307_v4 = vpop.f32.mrf.mxu1 }
  0xb3   :  { %v308_v27 = vadd.f32 %v307_v4, %v294_v1 }
  0xb9   :  { %v320_v6 = vpop.f32.mrf.mxu2  ;;  %v296_v9 = vpop.f32.mrf.mxu0 }
  0xba   :  { %v333_v10 = vpop.f32.mrf.mxu3  ;;  %v309_v14 = vpop.f32.mrf.mxu1 }
  0xbb   :  { %v334_v15 = vadd.f32 %v333_v10, %v320_v6 }
  0xc1   :  { %v322_v39 = vpop.f32.mrf.mxu2  ;;  %v378_v37 = vpop.f32.mrf.mxu0 }
  0xc2   :  { %v335_v43 = vpop.f32.mrf.mxu3  ;;  %v379_v13 = vadd.f32 %v378_v37, %v308_v27  ;;  %v391_v62 = vpop.f32.mrf.mxu1 }
  0xc3   :  { %v392_v19 = vadd.f32 %v391_v62, %v334_v15 }
  0xc4   :  { %1995 = vtanh.f32 %v379_v13  ;;  %v2549_v13 = vld [vmem:[%s3113_s6] sm:$0x1] }
  0xc5   :  { %1997 = vtanh.f32 %v392_v19  ;;  %3168 = vst [vmem:[#allocation29_spill] sm:$0xff] %v2549_v13 }
  0xc9   :  { %v380_v35 = vpop.f32.mrf.mxu0 }
  0xca   :  { %v1996_v41 = vpop.eup %1995  ;;  %v393_v58 = vpop.f32.mrf.mxu1 }
  0xcb   :  { %v1998_v9 = vpop.eup %1997  ;;  %v397_v50 = vpack.c.bf16 %v1996_v41, %v1996_v41 }
  0xcc   :  { %v398_v14 = vpack.c.bf16 %v1998_v9, %v1998_v9 }
  0xcd   :  { %535 = vmatmul.bf16.vlgmr.msrb.gmra.mxu2 %v397_v50  ;;  %630 = vmatmul.bf16.vlgmr.msra.gmra.mxu0 %v397_v50 }
  0xce   :  { %548 = vmatmul.bf16.vlgmr.msrb.gmra.mxu3 %v398_v14  ;;  %643 = vmatmul.bf16.vlgmr.msra.gmra.mxu1 %v398_v14 }
  0xcf   :  { %707 = vmatpush.bf16.msra.mxu0 %v2365_v18  ;;  %720 = vmatpush.bf16.msra.mxu1 %v2374_v22 }
  0xd0   :  { %801 = vmatpush.bf16.msrb.mxu2 %v2233_v3  ;;  %814 = vmatpush.bf16.msrb.mxu3 %v2235_v7 }
  0xd3   :  { %708 = vmatpush.bf16.msra.mxu0 %v2385_v26  ;;  %721 = vmatpush.bf16.msra.mxu1 %v2393_v30 }
  0xd4   :  { %802 = vmatpush.bf16.msrb.mxu2 %v2244_v16  ;;  %815 = vmatpush.bf16.msrb.mxu3 %v2246_v17 }
  0xd7   :  { %709 = vmatpush.bf16.msra.mxu0 %v2403_v31  ;;  %722 = vmatpush.bf16.msra.mxu1 %v2409_v36 }
  0xd8   :  { %803 = vmatpush.bf16.msrb.mxu2 %v2254_v29  ;;  %816 = vmatpush.bf16.msrb.mxu3 %v2258_v33 }
  0xdb   :  { %710 = vmatpush.bf16.msra.mxu0 %v2418_v40  ;;  %723 = vmatpush.bf16.msra.mxu1 %v2424_v42 }
  0xdc   :  { %804 = vmatpush.bf16.msrb.mxu2 %v2266_v44  ;;  %817 = vmatpush.bf16.msrb.mxu3 %v2270_v45 }
  0xdd   :  { %656 = vmatmul.bf16.vlgmr.msra.gmra.mxu2 %v397_v50 }
  0xde   :  { %669 = vmatmul.bf16.vlgmr.msra.gmra.mxu3 %v398_v14 }
  0xdf   :  { %711 = vmatpush.bf16.msra.mxu0 %v2449_v47  ;;  %724 = vmatpush.bf16.msra.mxu1 %v2454_v48 }
  0xe0   :  { %805 = vmatpush.bf16.msrb.mxu2 %v2278_v56  ;;  %818 = vmatpush.bf16.msrb.mxu3 %v2282_v57 }
  0xe3   :  { %712 = vmatpush.bf16.msra.mxu0 %v2461_v49  ;;  %725 = vmatpush.bf16.msra.mxu1 %v2466_v51 }
  0xe4   :  { %806 = vmatpush.bf16.msrb.mxu2 %v2290_v5  ;;  %819 = vmatpush.bf16.msrb.mxu3 %v2294_v11 }
  0xe7   :  { %713 = vmatpush.bf16.msra.mxu0 %v2473_v52  ;;  %726 = vmatpush.bf16.msra.mxu1 %v2478_v53 }
  0xe8   :  { %807 = vmatpush.bf16.msrb.mxu2 %v2311_v28  ;;  %820 = vmatpush.bf16.msrb.mxu3 %v2321_v32 }
  0xeb   :  { %714 = vmatpush.bf16.msra.mxu0 %v2485_v54  ;;  %727 = vmatpush.bf16.msra.mxu1 %v2490_v59 }
  0xec   :  { %808 = vmatpush.bf16.msrb.mxu2 %v2330_v55  ;;  %821 = vmatpush.bf16.msrb.mxu3 %v2334_v60 }
  0xf0   :  { %862 = vmatpush.bf16.msra.mxu2 %v2341_v0  ;;  %875 = vmatpush.bf16.msra.mxu3 %v2345_v2 }
  0xf4   :  { %863 = vmatpush.bf16.msra.mxu2 %v2369_v20  ;;  %876 = vmatpush.bf16.msra.mxu3 %v2377_v23 }
 0x14a   :  { %v631_v50 = vpop.f32.mrf.mxu0 }
 0x14b   :  { %v644_v58 = vpop.f32.mrf.mxu1 }
 0x14c   :  { %v645_v62 = vadd.f32 %v644_v58, %v631_v50 }
 0x150   :  { %v536_v19 = vpop.f32.mrf.mxu2 }
 0x151   :  { %v537_v35 = vadd.f32 %v536_v19, %v2549_v13  ;;  %v549_v41 = vpop.f32.mrf.mxu3 }
 0x152   :  { %v633_v37 = vpop.f32.mrf.mxu0 }
 0x153   :  { %v2552_v1 = vadd.f32 %v549_v41, %v537_v35  ;;  %v646_v4 = vpop.f32.mrf.mxu1 }
 0x155   :  { %3169 = vst [vmem:[#allocation30_spill] sm:$0xff] %v2552_v1  ;;  %v554_v6 = vsel %vm553_vm4, %v2552_v1, -inf }
 0x156   :  { %555 = vmax.xlane.f32.xlu0 %v554_v6 }
 0x158   :  { %v538_v10 = vpop.f32.mrf.mxu2 }
 0x159   :  { %v551_v15 = vpop.f32.mrf.mxu3 }
 0x160   :  { %v657_v27 = vpop.f32.mrf.mxu2 }
 0x161   :  { %v670_v39 = vpop.f32.mrf.mxu3 }
 0x162   :  { %v671_v43 = vadd.f32 %v670_v39, %v657_v27 }
 0x168   :  { %v659_v9 = vpop.f32.mrf.mxu2 }
 0x169   :  { %v672_v14 = vpop.f32.mrf.mxu3 }
 0x1c9   :  { %v2556_v50 = vpop.xlane.xlu0 %555 }
 0x1ca   :  { %3170 = vst [vmem:[#allocation31_spill] sm:$0xff] %v2556_v50  ;;  %vm557_vm5 = vcmp.ge.f32.partialorder %v2552_v1, %v2556_v50  ;;  %v3171_v1 = vmov 0.0  }
 0x1cb   :  { %v558_v58 = vsel %vm557_vm5, %v2379_v24, 29 }
 0x1cc   :  { %v559_v19 = vsel %vm553_vm4, %v558_v58, 2147483647  ;;  %v3172_v58 = vld [vmem:[#allocation14_spill] sm:$0xff] }
 0x1cd   :  { %v561_v35 = vshra.s32 %v559_v19, 16  ;;  %v560_v37 = vand.u32 65535, %v559_v19  ;;  %v3174_v19 = vld [vmem:[#allocation16_spill] sm:$0xff] }
 0x1cf   :  { %v563_v41 = vcvt.s32.f32 %v561_v35  ;;  %v562_v6 = vcvt.s32.f32 %v560_v37  ;;  %v3176_v35 = vld [vmem:[#allocation18_spill] sm:$0xff]  ;;  %v3178_v37 = vld [vmem:[#allocation20_spill] sm:$0xff] }
 0x1d1   :  { %564 = vmin.xlane.f32.xlu0 %v563_v41 }
 0x244   :  { %v565_v4 = vpop.xlane.xlu0 %564 }
 0x245   :  { %vm566_vm6 = vcmp.eq.f32.partialorder %v563_v41, %v565_v4  ;;  %v571_v15 = vcvt.f32.s32 %v565_v4  ;;  %v3177_v41 = vld [vmem:[#allocation19_spill] sm:$0xff] }
 0x246   :  { %v567_v10 = vsel %vm566_vm6, %v562_v6, inf }
 0x247   :  { %568 = vmin.xlane.f32.xlu1 %v567_v10  ;;  %v572_v39 = vshll.u32 %v571_v15, 16 }
 0x2ba   :  { %v569_v27 = vpop.xlane.xlu1 %568 }
 0x2bb   :  { %v570_v9 = vcvt.f32.s32 %v569_v27 }
 0x2bd   :  { %v573_v14 = vadd.s32 %v572_v39, %v570_v9 }
 0x2bf   :  { %vm618_vm7 = vcmp.eq.s32.totalorder %v2379_v24, %v573_v14 }
 0x2c0   :  { %v1907_v50 = vsel %vm618_vm7, 1.0, %v3171_v1 }
 0x2c1   :  { %v621_v13 = vpack.c.bf16 %v1907_v50, %v1907_v50  ;;  %v3173_v50 = vld [vmem:[#allocation15_spill] sm:$0xff] }
 0x2c3   :  { %1908 = vmatmul.msk.bf16.vlgmr.msrb.gmra.mxu0 %vm355_vm3, %v621_v13  ;;  %1909 = vmatmul.msk.bf16.vlgmr.msrb.gmra.mxu1 %vm355_vm3, %v621_v13  ;;  %v3175_v13 = vld [vmem:[#allocation17_spill] sm:$0xff] }
 0x2c4   :  { %827 = vmatpush.bf16.msrb.mxu0 %v2237_v8  ;;  %840 = vmatpush.bf16.msrb.mxu1 %v2240_v12 }
 0x2c8   :  { %828 = vmatpush.bf16.msrb.mxu0 %v2249_v21  ;;  %841 = vmatpush.bf16.msrb.mxu1 %v2251_v25 }
 0x2cc   :  { %829 = vmatpush.bf16.msrb.mxu0 %v2260_v34  ;;  %842 = vmatpush.bf16.msrb.mxu1 %v2263_v38 }
 0x2d0   :  { %830 = vmatpush.bf16.msrb.mxu0 %v2272_v46  ;;  %843 = vmatpush.bf16.msrb.mxu1 %v3172_v58 }
 0x2d4   :  { %831 = vmatpush.bf16.msrb.mxu0 %v3173_v50  ;;  %844 = vmatpush.bf16.msrb.mxu1 %v3174_v19 }
 0x2d8   :  { %832 = vmatpush.bf16.msrb.mxu0 %v3175_v13  ;;  %845 = vmatpush.bf16.msrb.mxu1 %v3176_v35 }
 0x2dc   :  { %833 = vmatpush.bf16.msrb.mxu0 %v3177_v41  ;;  %846 = vmatpush.bf16.msrb.mxu1 %v3178_v37 }
 0x2e0   :  { %834 = vmatpush.bf16.msrb.mxu0 %v2336_v61  ;;  %847 = vmatpush.bf16.msrb.mxu1 %v2339_v63 }
 0x340   :  { %v686_v4 = vpop.f32.mrf.mxu0  ;;  %v699_v6 = vpop.f32.mrf.mxu1 }
 0x341   :  { %v687_v10 = vadd.f32 %v686_v4, %v645_v62  ;;  %v700_v15 = vadd.f32 %v699_v6, %v671_v43  ;;  %v3179_v43 = vld [vmem:[#allocation29_spill] sm:$0xff] }
 0x343   :  { %1999 = vtanh.f32 %v687_v10 }
 0x344   :  { %2001 = vtanh.f32 %v700_v15 }
 0x348   :  { %v688_v27 = vpop.f32.mrf.mxu0  ;;  %v701_v39 = vpop.f32.mrf.mxu1 }
 0x349   :  { %v2000_v9 = vpop.eup %1999 }
 0x34a   :  { %v2002_v14 = vpop.eup %2001  ;;  %v705_v13 = vpack.c.bf16 %v2000_v9, %v2000_v9 }
 0x34b   :  { %v706_v35 = vpack.c.bf16 %v2002_v14, %v2002_v14 }
 0x34c   :  { %715 = vmatmul.bf16.vlgmr.msra.gmra.mxu0 %v705_v13  ;;  %809 = vmatmul.bf16.vlgmr.msrb.gmra.mxu2 %v705_v13 }
 0x34d   :  { %728 = vmatmul.bf16.vlgmr.msra.gmra.mxu1 %v706_v35  ;;  %822 = vmatmul.bf16.vlgmr.msrb.gmra.mxu3 %v706_v35 }
 0x34e   :  { %886 = vmatpush.bf16.msrb.mxu2 %v2365_v18  ;;  %899 = vmatpush.bf16.msrb.mxu3 %v2374_v22 }
 0x34f   :  { %980 = vmatpush.bf16.msra.mxu0 %v2233_v3  ;;  %993 = vmatpush.bf16.msra.mxu1 %v2235_v7 }
 0x352   :  { %887 = vmatpush.bf16.msrb.mxu2 %v2385_v26  ;;  %900 = vmatpush.bf16.msrb.mxu3 %v2393_v30 }
 0x353   :  { %981 = vmatpush.bf16.msra.mxu0 %v2244_v16  ;;  %994 = vmatpush.bf16.msra.mxu1 %v2246_v17 }
 0x356   :  { %888 = vmatpush.bf16.msrb.mxu2 %v2403_v31  ;;  %901 = vmatpush.bf16.msrb.mxu3 %v2409_v36 }
 0x357   :  { %982 = vmatpush.bf16.msra.mxu0 %v2254_v29  ;;  %995 = vmatpush.bf16.msra.mxu1 %v2258_v33 }
 0x35a   :  { %889 = vmatpush.bf16.msrb.mxu2 %v2418_v40  ;;  %902 = vmatpush.bf16.msrb.mxu3 %v2424_v42 }
 0x35b   :  { %983 = vmatpush.bf16.msra.mxu0 %v2266_v44  ;;  %996 = vmatpush.bf16.msra.mxu1 %v2270_v45 }
 0x35c   :  { %835 = vmatmul.bf16.vlgmr.msrb.gmra.mxu0 %v705_v13 }
 0x35d   :  { %848 = vmatmul.bf16.vlgmr.msrb.gmra.mxu1 %v706_v35 }
 0x35e   :  { %890 = vmatpush.bf16.msrb.mxu2 %v2449_v47  ;;  %903 = vmatpush.bf16.msrb.mxu3 %v2454_v48 }
 0x35f   :  { %984 = vmatpush.bf16.msra.mxu0 %v2278_v56  ;;  %997 = vmatpush.bf16.msra.mxu1 %v2282_v57 }
 0x362   :  { %891 = vmatpush.bf16.msrb.mxu2 %v2461_v49  ;;  %904 = vmatpush.bf16.msrb.mxu3 %v2466_v51 }
 0x363   :  { %985 = vmatpush.bf16.msra.mxu0 %v2290_v5  ;;  %998 = vmatpush.bf16.msra.mxu1 %v2294_v11 }
 0x366   :  { %892 = vmatpush.bf16.msrb.mxu2 %v2473_v52  ;;  %905 = vmatpush.bf16.msrb.mxu3 %v2478_v53 }
 0x367   :  { %986 = vmatpush.bf16.msra.mxu0 %v2311_v28  ;;  %999 = vmatpush.bf16.msra.mxu1 %v2321_v32 }
 0x36a   :  { %893 = vmatpush.bf16.msrb.mxu2 %v2485_v54  ;;  %906 = vmatpush.bf16.msrb.mxu3 %v2490_v59 }
 0x36b   :  { %987 = vmatpush.bf16.msra.mxu0 %v2330_v55  ;;  %1000 = vmatpush.bf16.msra.mxu1 %v2334_v60 }
 0x36f   :  { %1041 = vmatpush.bf16.msrb.mxu0 %v2341_v0  ;;  %1054 = vmatpush.bf16.msrb.mxu1 %v2345_v2 }
 0x373   :  { %1042 = vmatpush.bf16.msrb.mxu0 %v2369_v20  ;;  %1055 = vmatpush.bf16.msrb.mxu1 %v2377_v23 }
 0x3c9   :  { %v716_v62 = vpop.f32.mrf.mxu0 }
 0x3ca   :  { %v717_v13 = vadd.f32 %v716_v62, %v3179_v43  ;;  %v729_v35 = vpop.f32.mrf.mxu1 }
 0x3cc   :  { %v2619_v4 = vadd.f32 %v729_v35, %v717_v13 }
 0x3ce   :  { %3180 = vst [vmem:[#allocation14_spill] sm:$0xff] %v2619_v4  ;;  %v733_v6 = vsel %vm553_vm4, %v2619_v4, -inf }
 0x3cf   :  { %v810_v10 = vpop.f32.mrf.mxu2  ;;  %734 = vmax.xlane.f32.xlu1 %v733_v6 }
 0x3d0   :  { %v823_v15 = vpop.f32.mrf.mxu3 }
 0x3d1   :  { %v824_v27 = vadd.f32 %v823_v15, %v810_v10  ;;  %v718_v39 = vpop.f32.mrf.mxu0 }
 0x3d2   :  { %v731_v9 = vpop.f32.mrf.mxu1 }
 0x3d7   :  { %v812_v14 = vpop.f32.mrf.mxu2 }
 0x3d8   :  { %v825_v2 = vpop.f32.mrf.mxu3 }
 0x3d9   :  { %v836_v20 = vpop.f32.mrf.mxu0 }
 0x3da   :  { %v849_v0 = vpop.f32.mrf.mxu1 }
 0x3db   :  { %v850_v23 = vadd.f32 %v849_v0, %v836_v20 }
 0x3e1   :  { %v838_v60 = vpop.f32.mrf.mxu0 }
 0x3e2   :  { %v851_v55 = vpop.f32.mrf.mxu1 }
 0x442   :  { %v2623_v62 = vpop.xlane.xlu1 %734 }
 0x443   :  { %3181 = vst [vmem:[#allocation15_spill] sm:$0xff] %v2623_v62  ;;  %vm736_vm8 = vcmp.ge.f32.partialorder %v2619_v4, %v2623_v62 }
 0x444   :  { %v737_v13 = vsel %vm736_vm8, %v2379_v24, 29 }
 0x445   :  { %v738_v35 = vsel %vm553_vm4, %v737_v13, 2147483647 }
 0x446   :  { %v740_v6 = vshra.s32 %v738_v35, 16  ;;  %v739_v15 = vand.u32 65535, %v738_v35 }
 0x448   :  { %v742_v10 = vcvt.s32.f32 %v740_v6  ;;  %v741_v2 = vcvt.s32.f32 %v739_v15 }
 0x44a   :  { %743 = vmin.xlane.f32.xlu2 %v742_v10 }
 0x4bd   :  { %v744_v39 = vpop.xlane.xlu2 %743 }
 0x4be   :  { %vm745_vm9 = vcmp.eq.f32.partialorder %v742_v10, %v744_v39  ;;  %v750_v60 = vcvt.f32.s32 %v744_v39 }
 0x4bf   :  { %v746_v9 = vsel %vm745_vm9, %v741_v2, inf }
 0x4c0   :  { %747 = vmin.xlane.f32.xlu2 %v746_v9  ;;  %v751_v0 = vshll.u32 %v750_v60, 16 }
 0x533   :  { %v748_v55 = vpop.xlane.xlu2 %747 }
 0x534   :  { %v749_v20 = vcvt.f32.s32 %v748_v55 }
 0x536   :  { %v752_v14 = vadd.s32 %v751_v0, %v749_v20  ;;  %v3186_v0 = vld [vmem:[#allocation23_spill] sm:$0xff]  ;;  %v3187_v20 = vld [vmem:[#allocation24_spill] sm:$0xff] }
 0x538   :  { %vm797_vm10 = vcmp.eq.s32.totalorder %v2379_v24, %v752_v14  ;;  %v3188_v14 = vld [vmem:[#allocation25_spill] sm:$0xff] }
 0x539   :  { %v1912_v4 = vsel %vm797_vm10, 1.0, %v3171_v1 }
 0x53a   :  { %v800_v62 = vpack.c.bf16 %v1912_v4, %v1912_v4  ;;  %v3182_v4 = vld [vmem:[#allocation17_spill] sm:$0xff] }
 0x53c   :  { %1913 = vmatmul.msk.bf16.vlgmr.msra.gmra.mxu2 %vm355_vm3, %v800_v62  ;;  %1914 = vmatmul.msk.bf16.vlgmr.msra.gmra.mxu3 %vm355_vm3, %v800_v62  ;;  %v3183_v62 = vld [vmem:[#allocation18_spill] sm:$0xff] }
 0x53d   :  { %1006 = vmatpush.bf16.msra.mxu2 %v2237_v8  ;;  %1019 = vmatpush.bf16.msra.mxu3 %v2240_v12 }
 0x541   :  { %1007 = vmatpush.bf16.msra.mxu2 %v2249_v21  ;;  %1020 = vmatpush.bf16.msra.mxu3 %v2251_v25 }
 0x545   :  { %1008 = vmatpush.bf16.msra.mxu2 %v2260_v34  ;;  %1021 = vmatpush.bf16.msra.mxu3 %v2263_v38 }
 0x549   :  { %1009 = vmatpush.bf16.msra.mxu2 %v2272_v46  ;;  %1022 = vmatpush.bf16.msra.mxu3 %v3172_v58 }
 0x54d   :  { %1010 = vmatpush.bf16.msra.mxu2 %v3173_v50  ;;  %1023 = vmatpush.bf16.msra.mxu3 %v3174_v19 }
 0x551   :  { %1011 = vmatpush.bf16.msra.mxu2 %v3182_v4  ;;  %1024 = vmatpush.bf16.msra.mxu3 %v3183_v62 }
 0x555   :  { %1012 = vmatpush.bf16.msra.mxu2 %v3177_v41  ;;  %1025 = vmatpush.bf16.msra.mxu3 %v3178_v37 }
 0x559   :  { %1013 = vmatpush.bf16.msra.mxu2 %v2336_v61  ;;  %1026 = vmatpush.bf16.msra.mxu3 %v2339_v63 }
 0x5bf   :  { %v865_v13 = vpop.f32.mrf.mxu2  ;;  %v878_v35 = vpop.f32.mrf.mxu3 }
 0x5c0   :  { %v866_v6 = vadd.f32 %v865_v13, %v824_v27  ;;  %v879_v10 = vadd.f32 %v878_v35, %v850_v23  ;;  %v3184_v23 = vld [vmem:[#allocation21_spill] sm:$0xff]  ;;  %v3185_v27 = vld [vmem:[#allocation22_spill] sm:$0xff] }
 0x5c1   :  { %v3189_v13 = vld [vmem:[#allocation26_spill] sm:$0xff] }
 0x5c2   :  { %2003 = vtanh.f32 %v866_v6 }
 0x5c3   :  { %2005 = vtanh.f32 %v879_v10 }
 0x5c7   :  { %v867_v15 = vpop.f32.mrf.mxu2  ;;  %v880_v39 = vpop.f32.mrf.mxu3 }
 0x5c8   :  { %v2004_v2 = vpop.eup %2003 }
 0x5c9   :  { %v2006_v9 = vpop.eup %2005  ;;  %v884_v60 = vpack.c.bf16 %v2004_v2, %v2004_v2 }
 0x5ca   :  { %v885_v55 = vpack.c.bf16 %v2006_v9, %v2006_v9 }
 0x5cb   :  { %894 = vmatmul.bf16.vlgmr.msrb.gmra.mxu2 %v884_v60  ;;  %988 = vmatmul.bf16.vlgmr.msra.gmra.mxu0 %v884_v60 }
 0x5cc   :  { %907 = vmatmul.bf16.vlgmr.msrb.gmra.mxu3 %v885_v55  ;;  %1001 = vmatmul.bf16.vlgmr.msra.gmra.mxu1 %v885_v55 }
 0x5cd   :  { %1065 = vmatpush.bf16.msra.mxu0 %v2365_v18  ;;  %1078 = vmatpush.bf16.msra.mxu1 %v2374_v22 }
 0x5ce   :  { %1159 = vmatpush.bf16.msrb.mxu2 %v2233_v3  ;;  %1172 = vmatpush.bf16.msrb.mxu3 %v2235_v7 }
 0x5d1   :  { %1066 = vmatpush.bf16.msra.mxu0 %v2385_v26  ;;  %1079 = vmatpush.bf16.msra.mxu1 %v2393_v30 }
 0x5d2   :  { %1160 = vmatpush.bf16.msrb.mxu2 %v2244_v16  ;;  %1173 = vmatpush.bf16.msrb.mxu3 %v2246_v17 }
 0x5d5   :  { %1067 = vmatpush.bf16.msra.mxu0 %v2403_v31  ;;  %1080 = vmatpush.bf16.msra.mxu1 %v2409_v36 }
 0x5d6   :  { %1161 = vmatpush.bf16.msrb.mxu2 %v2254_v29  ;;  %1174 = vmatpush.bf16.msrb.mxu3 %v2258_v33 }
 0x5d9   :  { %1068 = vmatpush.bf16.msra.mxu0 %v2418_v40  ;;  %1081 = vmatpush.bf16.msra.mxu1 %v2424_v42 }
 0x5da   :  { %1162 = vmatpush.bf16.msrb.mxu2 %v2266_v44  ;;  %1175 = vmatpush.bf16.msrb.mxu3 %v2270_v45 }
 0x5db   :  { %1014 = vmatmul.bf16.vlgmr.msra.gmra.mxu2 %v884_v60 }
 0x5dc   :  { %1027 = vmatmul.bf16.vlgmr.msra.gmra.mxu3 %v885_v55 }
 0x5dd   :  { %1069 = vmatpush.bf16.msra.mxu0 %v2449_v47  ;;  %1082 = vmatpush.bf16.msra.mxu1 %v2454_v48 }
 0x5de   :  { %1163 = vmatpush.bf16.msrb.mxu2 %v2278_v56  ;;  %1176 = vmatpush.bf16.msrb.mxu3 %v2282_v57 }
 0x5e1   :  { %1070 = vmatpush.bf16.msra.mxu0 %v2461_v49  ;;  %1083 = vmatpush.bf16.msra.mxu1 %v2466_v51 }
 0x5e2   :  { %1164 = vmatpush.bf16.msrb.mxu2 %v2290_v5  ;;  %1177 = vmatpush.bf16.msrb.mxu3 %v2294_v11 }
 0x5e5   :  { %1071 = vmatpush.bf16.msra.mxu0 %v2473_v52  ;;  %1084 = vmatpush.bf16.msra.mxu1 %v2478_v53 }
 0x5e6   :  { %1165 = vmatpush.bf16.msrb.mxu2 %v2311_v28  ;;  %1178 = vmatpush.bf16.msrb.mxu3 %v2321_v32 }
 0x5e9   :  { %1072 = vmatpush.bf16.msra.mxu0 %v2485_v54  ;;  %1085 = vmatpush.bf16.msra.mxu1 %v2490_v59 }
 0x5ea   :  { %1166 = vmatpush.bf16.msrb.mxu2 %v3184_v23  ;;  %1179 = vmatpush.bf16.msrb.mxu3 %v3185_v27 }
 0x5ee   :  { %1220 = vmatpush.bf16.msra.mxu2 %v3186_v0  ;;  %1233 = vmatpush.bf16.msra.mxu3 %v3187_v20 }
 0x5f2   :  { %1221 = vmatpush.bf16.msra.mxu2 %v3188_v14  ;;  %1234 = vmatpush.bf16.msra.mxu3 %v3189_v13 }
 0x648   :  { %v989_v35 = vpop.f32.mrf.mxu0 }
 0x649   :  { %v1002_v6 = vpop.f32.mrf.mxu1 }
 0x64a   :  { %v1003_v10 = vadd.f32 %v1002_v6, %v989_v35 }
 0x64e   :  { %v895_v15 = vpop.f32.mrf.mxu2 }
 0x64f   :  { %v896_v39 = vadd.f32 %v895_v15, %v3179_v43  ;;  %v908_v2 = vpop.f32.mrf.mxu3 }
 0x650   :  { %v991_v9 = vpop.f32.mrf.mxu0 }
 0x651   :  { %v2686_v60 = vadd.f32 %v908_v2, %v896_v39  ;;  %v1004_v55 = vpop.f32.mrf.mxu1 }
 0x653   :  { %3190 = vst [vmem:[#allocation16_spill] sm:$0xff] %v2686_v60  ;;  %v912_v0 = vsel %vm553_vm4, %v2686_v60, -inf }
 0x654   :  { %913 = vmax.xlane.f32.xlu0 %v912_v0 }
 0x656   :  { %v897_v20 = vpop.f32.mrf.mxu2 }
 0x657   :  { %v910_v27 = vpop.f32.mrf.mxu3 }
 0x65e   :  { %v1015_v14 = vpop.f32.mrf.mxu2 }
 0x65f   :  { %v1028_v23 = vpop.f32.mrf.mxu3 }
 0x660   :  { %v1029_v13 = vadd.f32 %v1028_v23, %v1015_v14 }
 0x666   :  { %v1017_v59 = vpop.f32.mrf.mxu2 }
 0x667   :  { %v1030_v54 = vpop.f32.mrf.mxu3 }
 0x6c7   :  { %v2690_v35 = vpop.xlane.xlu0 %913 }
 0x6c8   :  { %3191 = vst [vmem:[#allocation19_spill] sm:$0xff] %v2690_v35  ;;  %vm915_vm11 = vcmp.ge.f32.partialorder %v2686_v60, %v2690_v35 }
 0x6c9   :  { %v916_v6 = vsel %vm915_vm11, %v2379_v24, 29 }
 0x6ca   :  { %v917_v15 = vsel %vm553_vm4, %v916_v6, 2147483647 }
 0x6cb   :  { %v919_v39 = vshra.s32 %v917_v15, 16  ;;  %v918_v0 = vand.u32 65535, %v917_v15 }
 0x6cd   :  { %v921_v2 = vcvt.s32.f32 %v919_v39  ;;  %v920_v27 = vcvt.s32.f32 %v918_v0 }
 0x6cf   :  { %922 = vmin.xlane.f32.xlu1 %v921_v2 }
 0x742   :  { %v923_v20 = vpop.xlane.xlu1 %922 }
 0x743   :  { %vm924_vm12 = vcmp.eq.f32.partialorder %v921_v2, %v923_v20  ;;  %v929_v59 = vcvt.f32.s32 %v923_v20 }
 0x744   :  { %v925_v9 = vsel %vm924_vm12, %v920_v27, inf }
 0x745   :  { %926 = vmin.xlane.f32.xlu2 %v925_v9  ;;  %v930_v23 = vshll.u32 %v929_v59, 16 }
 0x7b8   :  { %v927_v54 = vpop.xlane.xlu2 %926 }
 0x7b9   :  { %v928_v14 = vcvt.f32.s32 %v927_v54 }
 0x7bb   :  { %v931_v55 = vadd.s32 %v930_v23, %v928_v14 }
 0x7bd   :  { %vm976_vm13 = vcmp.eq.s32.totalorder %v2379_v24, %v931_v55 }
 0x7be   :  { %v1917_v60 = vsel %vm976_vm13, 1.0, %v3171_v1 }
 0x7bf   :  { %v979_v35 = vpack.c.bf16 %v1917_v60, %v1917_v60 }
 0x7c1   :  { %1918 = vmatmul.msk.bf16.vlgmr.msrb.gmra.mxu0 %vm355_vm3, %v979_v35  ;;  %1919 = vmatmul.msk.bf16.vlgmr.msrb.gmra.mxu1 %vm355_vm3, %v979_v35 }
 0x7c2   :  { %1185 = vmatpush.bf16.msrb.mxu0 %v2237_v8  ;;  %1198 = vmatpush.bf16.msrb.mxu1 %v2240_v12 }
 0x7c6   :  { %1186 = vmatpush.bf16.msrb.mxu0 %v2249_v21  ;;  %1199 = vmatpush.bf16.msrb.mxu1 %v2251_v25 }
 0x7ca   :  { %1187 = vmatpush.bf16.msrb.mxu0 %v2260_v34  ;;  %1200 = vmatpush.bf16.msrb.mxu1 %v2263_v38 }
 0x7ce   :  { %1188 = vmatpush.bf16.msrb.mxu0 %v2272_v46  ;;  %1201 = vmatpush.bf16.msrb.mxu1 %v3172_v58 }
 0x7d2   :  { %1189 = vmatpush.bf16.msrb.mxu0 %v3173_v50  ;;  %1202 = vmatpush.bf16.msrb.mxu1 %v3174_v19 }
 0x7d6   :  { %1190 = vmatpush.bf16.msrb.mxu0 %v3182_v4  ;;  %1203 = vmatpush.bf16.msrb.mxu1 %v3183_v62 }
 0x7da   :  { %1191 = vmatpush.bf16.msrb.mxu0 %v3177_v41  ;;  %1204 = vmatpush.bf16.msrb.mxu1 %v3178_v37 }
 0x7de   :  { %1192 = vmatpush.bf16.msrb.mxu0 %v2336_v61  ;;  %1205 = vmatpush.bf16.msrb.mxu1 %v2339_v63 }
 0x83e   :  { %v1044_v60 = vpop.f32.mrf.mxu0  ;;  %v1057_v35 = vpop.f32.mrf.mxu1 }
 0x83f   :  { %v1045_v6 = vadd.f32 %v1044_v60, %v1003_v10  ;;  %v1058_v15 = vadd.f32 %v1057_v35, %v1029_v13 }
 0x841   :  { %2007 = vtanh.f32 %v1045_v6 }
 0x842   :  { %2009 = vtanh.f32 %v1058_v15 }
 0x846   :  { %v1046_v39 = vpop.f32.mrf.mxu0  ;;  %v1059_v2 = vpop.f32.mrf.mxu1 }
 0x847   :  { %v2008_v0 = vpop.eup %2007 }
 0x848   :  { %v2010_v20 = vpop.eup %2009  ;;  %v1063_v27 = vpack.c.bf16 %v2008_v0, %v2008_v0 }
 0x849   :  { %v1064_v9 = vpack.c.bf16 %v2010_v20, %v2010_v20 }
 0x84a   :  { %1073 = vmatmul.bf16.vlgmr.msra.gmra.mxu0 %v1063_v27  ;;  %1167 = vmatmul.bf16.vlgmr.msrb.gmra.mxu2 %v1063_v27 }
 0x84b   :  { %1086 = vmatmul.bf16.vlgmr.msra.gmra.mxu1 %v1064_v9  ;;  %1180 = vmatmul.bf16.vlgmr.msrb.gmra.mxu3 %v1064_v9 }
 0x84c   :  { %1244 = vmatpush.bf16.msrb.mxu2 %v2365_v18  ;;  %1257 = vmatpush.bf16.msrb.mxu3 %v2374_v22  ;;  %v3192_v18 = vld [vmem:[#allocation27_spill] sm:$0xff]  ;;  %v3193_v22 = vld [vmem:[#allocation28_spill] sm:$0xff] }
 0x84d   :  { %1338 = vmatpush.bf16.msra.mxu0 %v2233_v3  ;;  %1351 = vmatpush.bf16.msra.mxu1 %v2235_v7 }
 0x850   :  { %1245 = vmatpush.bf16.msrb.mxu2 %v2385_v26  ;;  %1258 = vmatpush.bf16.msrb.mxu3 %v2393_v30  ;;  %v3194_v26 = vld [vmem:[#allocation21_spill] sm:$0xff]  ;;  %v3195_v30 = vld [vmem:[#allocation22_spill] sm:$0xff] }
 0x851   :  { %1339 = vmatpush.bf16.msra.mxu0 %v2244_v16  ;;  %1352 = vmatpush.bf16.msra.mxu1 %v2246_v17 }
 0x854   :  { %1246 = vmatpush.bf16.msrb.mxu2 %v2403_v31  ;;  %1259 = vmatpush.bf16.msrb.mxu3 %v2409_v36  ;;  %v3196_v31 = vld [vmem:[#allocation23_spill] sm:$0xff]  ;;  %v3197_v36 = vld [vmem:[#allocation24_spill] sm:$0xff] }
 0x855   :  { %1340 = vmatpush.bf16.msra.mxu0 %v2254_v29  ;;  %1353 = vmatpush.bf16.msra.mxu1 %v2258_v33 }
 0x858   :  { %1247 = vmatpush.bf16.msrb.mxu2 %v2418_v40  ;;  %1260 = vmatpush.bf16.msrb.mxu3 %v2424_v42  ;;  %v3198_v40 = vld [vmem:[#allocation25_spill] sm:$0xff]  ;;  %v3199_v42 = vld [vmem:[#allocation26_spill] sm:$0xff] }
 0x859   :  { %1341 = vmatpush.bf16.msra.mxu0 %v2266_v44  ;;  %1354 = vmatpush.bf16.msra.mxu1 %v2270_v45 }
 0x85a   :  { %1193 = vmatmul.bf16.vlgmr.msrb.gmra.mxu0 %v1063_v27 }
 0x85b   :  { %1206 = vmatmul.bf16.vlgmr.msrb.gmra.mxu1 %v1064_v9 }
 0x85c   :  { %1248 = vmatpush.bf16.msrb.mxu2 %v2449_v47  ;;  %1261 = vmatpush.bf16.msrb.mxu3 %v2454_v48 }
 0x85d   :  { %1342 = vmatpush.bf16.msra.mxu0 %v2278_v56  ;;  %1355 = vmatpush.bf16.msra.mxu1 %v2282_v57 }
 0x860   :  { %1249 = vmatpush.bf16.msrb.mxu2 %v2461_v49  ;;  %1262 = vmatpush.bf16.msrb.mxu3 %v2466_v51 }
 0x861   :  { %1343 = vmatpush.bf16.msra.mxu0 %v2290_v5  ;;  %1356 = vmatpush.bf16.msra.mxu1 %v2294_v11 }
 0x864   :  { %1250 = vmatpush.bf16.msrb.mxu2 %v2473_v52  ;;  %1263 = vmatpush.bf16.msrb.mxu3 %v2478_v53 }
 0x865   :  { %1344 = vmatpush.bf16.msra.mxu0 %v2311_v28  ;;  %1357 = vmatpush.bf16.msra.mxu1 %v2321_v32 }
 0x868   :  { %1251 = vmatpush.bf16.msrb.mxu2 %v3192_v18  ;;  %1264 = vmatpush.bf16.msrb.mxu3 %v3193_v22 }
 0x869   :  { %1345 = vmatpush.bf16.msra.mxu0 %v3194_v26  ;;  %1358 = vmatpush.bf16.msra.mxu1 %v3195_v30 }
 0x86d   :  { %1399 = vmatpush.bf16.msrb.mxu0 %v3196_v31  ;;  %1412 = vmatpush.bf16.msrb.mxu1 %v3197_v36 }
 0x871   :  { %1400 = vmatpush.bf16.msrb.mxu0 %v3198_v40  ;;  %1413 = vmatpush.bf16.msrb.mxu1 %v3199_v42 }
 0x8c7   :  { %v1074_v47 = vpop.f32.mrf.mxu0 }
 0x8c8   :  { %v1075_v48 = vadd.f32 %v1074_v47, %v3179_v43  ;;  %v1087_v49 = vpop.f32.mrf.mxu1 }
 0x8ca   :  { %v2753_v51 = vadd.f32 %v1087_v49, %v1075_v48 }
 0x8cc   :  { %v1091_v52 = vsel %vm553_vm4, %v2753_v51, -inf }
 0x8cd   :  { %v1168_v53 = vpop.f32.mrf.mxu2  ;;  %1092 = vmax.xlane.f32.xlu0 %v1091_v52 }
 0x8ce   :  { %v1181_v13 = vpop.f32.mrf.mxu3 }
 0x8cf   :  { %v1182_v10 = vadd.f32 %v1181_v13, %v1168_v53  ;;  %v1076_v59 = vpop.f32.mrf.mxu0 }
 0x8d0   :  { %v1089_v54 = vpop.f32.mrf.mxu1 }
 0x8d5   :  { %v1170_v23 = vpop.f32.mrf.mxu2 }
 0x8d6   :  { %v1183_v14 = vpop.f32.mrf.mxu3 }
 0x8d7   :  { %v1194_v55 = vpop.f32.mrf.mxu0 }
 0x8d8   :  { %v1207_v60 = vpop.f32.mrf.mxu1 }
 0x8d9   :  { %v1208_v35 = vadd.f32 %v1207_v60, %v1194_v55 }
 0x8df   :  { %v1196_v6 = vpop.f32.mrf.mxu0 }
 0x8e0   :  { %v1209_v15 = vpop.f32.mrf.mxu1 }
 0x940   :  { %v2757_v39 = vpop.xlane.xlu0 %1092 }
 0x941   :  { %vm1094_vm14 = vcmp.ge.f32.partialorder %v2753_v51, %v2757_v39 }
 0x942   :  { %v1095_v2 = vsel %vm1094_vm14, %v2379_v24, 29 }
 0x943   :  { %v1096_v0 = vsel %vm553_vm4, %v1095_v2, 2147483647 }
 0x944   :  { %v1098_v20 = vshra.s32 %v1096_v0, 16  ;;  %v1097_v9 = vand.u32 65535, %v1096_v0 }
 0x946   :  { %v1100_v27 = vcvt.s32.f32 %v1098_v20  ;;  %v1099_v22 = vcvt.s32.f32 %v1097_v9  ;;  %v2786_v9 = vld [vmem:[%s3112_s5 + $0x38] sm:$0xff] }
 0x948   :  { %1101 = vmin.xlane.f32.xlu1 %v1100_v27 }
 0x9bb   :  { %v1102_v18 = vpop.xlane.xlu1 %1101 }
 0x9bc   :  { %vm1103_vm15 = vcmp.eq.f32.partialorder %v1100_v27, %v1102_v18  ;;  %v1108_v48 = vcvt.f32.s32 %v1102_v18  ;;  %v2806_v18 = vld [vmem:[%s3112_s5 + $0x70] sm:$0xff] }
 0x9bd   :  { %v1104_v47 = vsel %vm1103_vm15, %v1099_v22, inf }
 0x9be   :  { %1105 = vmin.xlane.f32.xlu2 %v1104_v47  ;;  %v1109_v52 = vshll.u32 %v1108_v48, 16 }
 0xa31   :  { %v1106_v49 = vpop.xlane.xlu2 %1105 }
 0xa32   :  { %v1107_v53 = vcvt.f32.s32 %v1106_v49 }
 0xa34   :  { %v1110_v13 = vadd.s32 %v1109_v52, %v1107_v53 }
 0xa36   :  { %vm1155_vm0 = vcmp.eq.s32.totalorder %v2379_v24, %v1110_v13 }
 0xa37   :  { %v1922_v59 = vsel %vm1155_vm0, 1.0, %v3171_v1 }
 0xa38   :  { %v1158_v54 = vpack.c.bf16 %v1922_v59, %v1922_v59 }
 0xa3a   :  { %1923 = vmatmul.msk.bf16.vlgmr.msra.gmra.mxu2 %vm355_vm3, %v1158_v54  ;;  %1924 = vmatmul.msk.bf16.vlgmr.msra.gmra.mxu3 %vm355_vm3, %v1158_v54 }
 0xa3b   :  { %1364 = vmatpush.bf16.msra.mxu2 %v2237_v8  ;;  %1377 = vmatpush.bf16.msra.mxu3 %v2240_v12 }
 0xa3f   :  { %1365 = vmatpush.bf16.msra.mxu2 %v2249_v21  ;;  %1378 = vmatpush.bf16.msra.mxu3 %v2251_v25 }
 0xa43   :  { %1366 = vmatpush.bf16.msra.mxu2 %v2260_v34  ;;  %1379 = vmatpush.bf16.msra.mxu3 %v2263_v38 }
 0xa47   :  { %1367 = vmatpush.bf16.msra.mxu2 %v2272_v46  ;;  %1380 = vmatpush.bf16.msra.mxu3 %v3172_v58 }
 0xa4b   :  { %1368 = vmatpush.bf16.msra.mxu2 %v3173_v50  ;;  %1381 = vmatpush.bf16.msra.mxu3 %v3174_v19 }
 0xa4f   :  { %1369 = vmatpush.bf16.msra.mxu2 %v3182_v4  ;;  %1382 = vmatpush.bf16.msra.mxu3 %v3183_v62 }
 0xa53   :  { %1370 = vmatpush.bf16.msra.mxu2 %v3177_v41  ;;  %1383 = vmatpush.bf16.msra.mxu3 %v3178_v37 }
 0xa57   :  { %1371 = vmatpush.bf16.msra.mxu2 %v2336_v61  ;;  %1384 = vmatpush.bf16.msra.mxu3 %v2339_v63 }
 0xabd   :  { %v1223_v23 = vpop.f32.mrf.mxu2  ;;  %v1236_v14 = vpop.f32.mrf.mxu3 }
 0xabe   :  { %v1224_v55 = vadd.f32 %v1223_v23, %v1182_v10  ;;  %v1237_v60 = vadd.f32 %v1236_v14, %v1208_v35  ;;  %v2792_v10 = vld [vmem:[%s3112_s5 + $0x78] sm:$0xff]  ;;  %v2800_v35 = vld [vmem:[%s3112_s5 + $0x30] sm:$0xff] }
 0xac0   :  { %2011 = vtanh.f32 %v1224_v55 }
 0xac1   :  { %2013 = vtanh.f32 %v1237_v60 }
 0xac5   :  { %v1225_v6 = vpop.f32.mrf.mxu2  ;;  %v1238_v15 = vpop.f32.mrf.mxu3 }
 0xac6   :  { %v2012_v2 = vpop.eup %2011 }
 0xac7   :  { %v2014_v0 = vpop.eup %2013  ;;  %v1242_v20 = vpack.c.bf16 %v2012_v2, %v2012_v2 }
 0xac8   :  { %v1243_v27 = vpack.c.bf16 %v2014_v0, %v2014_v0 }
 0xac9   :  { %1252 = vmatmul.bf16.vlgmr.msrb.gmra.mxu2 %v1242_v20  ;;  %1346 = vmatmul.bf16.vlgmr.msra.gmra.mxu0 %v1242_v20 }
 0xaca   :  { %1265 = vmatmul.bf16.vlgmr.msrb.gmra.mxu3 %v1243_v27  ;;  %1359 = vmatmul.bf16.vlgmr.msra.gmra.mxu1 %v1243_v27 }
 0xacb   :  { %1423 = vmatpush.bf16.msra.mxu0 %v2786_v9  ;;  %1436 = vmatpush.bf16.msra.mxu1 %v2792_v10 }
 0xacc   :  { %1517 = vmatpush.bf16.msrb.mxu2 %v2233_v3  ;;  %1530 = vmatpush.bf16.msrb.mxu3 %v2235_v7  ;;  %v2814_v3 = vld [vmem:[%s3112_s5 + $0x28] sm:$0xff] }
 0xacd   :  { %v2820_v7 = vld [vmem:[%s3112_s5 + $0x68] sm:$0xff] }
 0xacf   :  { %1424 = vmatpush.bf16.msra.mxu0 %v2800_v35  ;;  %1437 = vmatpush.bf16.msra.mxu1 %v2806_v18 }
 0xad0   :  { %1518 = vmatpush.bf16.msrb.mxu2 %v2244_v16  ;;  %1531 = vmatpush.bf16.msrb.mxu3 %v2246_v17  ;;  %v2828_v16 = vld [vmem:[%s3112_s5 + $0x20] sm:$0xff] }
 0xad1   :  { %v2834_v17 = vld [vmem:[%s3112_s5 + $0x60] sm:$0xff] }
 0xad3   :  { %1425 = vmatpush.bf16.msra.mxu0 %v2814_v3  ;;  %1438 = vmatpush.bf16.msra.mxu1 %v2820_v7 }
 0xad4   :  { %1519 = vmatpush.bf16.msrb.mxu2 %v2254_v29  ;;  %1532 = vmatpush.bf16.msrb.mxu3 %v2258_v33  ;;  %v2842_v29 = vld [vmem:[%s3112_s5 + $0x18] sm:$0xff] }
 0xad5   :  { %v2848_v33 = vld [vmem:[%s3112_s5 + $0x58] sm:$0xff] }
 0xad7   :  { %1426 = vmatpush.bf16.msra.mxu0 %v2828_v16  ;;  %1439 = vmatpush.bf16.msra.mxu1 %v2834_v17 }
 0xad8   :  { %1520 = vmatpush.bf16.msrb.mxu2 %v2266_v44  ;;  %1533 = vmatpush.bf16.msrb.mxu3 %v2270_v45  ;;  %v2856_v44 = vld [vmem:[%s3112_s5 + $0x10] sm:$0xff] }
 0xad9   :  { %1372 = vmatmul.bf16.vlgmr.msra.gmra.mxu2 %v1242_v20  ;;  %v2862_v45 = vld [vmem:[%s3112_s5 + $0x50] sm:$0xff] }
 0xada   :  { %1385 = vmatmul.bf16.vlgmr.msra.gmra.mxu3 %v1243_v27 }
 0xadb   :  { %1427 = vmatpush.bf16.msra.mxu0 %v2842_v29  ;;  %1440 = vmatpush.bf16.msra.mxu1 %v2848_v33 }
 0xadc   :  { %1521 = vmatpush.bf16.msrb.mxu2 %v2278_v56  ;;  %1534 = vmatpush.bf16.msrb.mxu3 %v2282_v57  ;;  %v2870_v56 = vld [vmem:[%s3112_s5 + $0x8] sm:$0xff] }
 0xadd   :  { %v2876_v57 = vld [vmem:[%s3112_s5 + $0x48] sm:$0xff] }
 0xadf   :  { %1428 = vmatpush.bf16.msra.mxu0 %v2856_v44  ;;  %1441 = vmatpush.bf16.msra.mxu1 %v2862_v45 }
 0xae0   :  { %1522 = vmatpush.bf16.msrb.mxu2 %v2290_v5  ;;  %1535 = vmatpush.bf16.msrb.mxu3 %v2294_v11  ;;  %v2884_v5 = vld [vmem:[%s3112_s5] sm:$0xff] }
 0xae1   :  { %v2890_v11 = vld [vmem:[%s3112_s5 + $0x40] sm:$0xff] }
 0xae3   :  { %1429 = vmatpush.bf16.msra.mxu0 %v2870_v56  ;;  %1442 = vmatpush.bf16.msra.mxu1 %v2876_v57 }
 0xae4   :  { %1523 = vmatpush.bf16.msrb.mxu2 %v2311_v28  ;;  %1536 = vmatpush.bf16.msrb.mxu3 %v2321_v32 }
 0xae7   :  { %1430 = vmatpush.bf16.msra.mxu0 %v2884_v5  ;;  %1443 = vmatpush.bf16.msra.mxu1 %v2890_v11 }
 0xae8   :  { %1524 = vmatpush.bf16.msrb.mxu2 %v3194_v26  ;;  %1537 = vmatpush.bf16.msrb.mxu3 %v3195_v30 }
 0xaec   :  { %1578 = vmatpush.bf16.msra.mxu2 %v3196_v31  ;;  %1591 = vmatpush.bf16.msra.mxu3 %v3197_v36 }
 0xaf0   :  { %1579 = vmatpush.bf16.msra.mxu2 %v3198_v40  ;;  %1592 = vmatpush.bf16.msra.mxu3 %v3199_v42 }
 0xb46   :  { %v1347_v28 = vpop.f32.mrf.mxu0 }
 0xb47   :  { %v1360_v32 = vpop.f32.mrf.mxu1 }
 0xb48   :  { %v1361_v22 = vadd.f32 %v1360_v32, %v1347_v28 }
 0xb4c   :  { %v1253_v47 = vpop.f32.mrf.mxu2 }
 0xb4d   :  { %v1254_v48 = vadd.f32 %v1253_v47, %v3179_v43  ;;  %v1266_v49 = vpop.f32.mrf.mxu3 }
 0xb4e   :  { %v1349_v52 = vpop.f32.mrf.mxu0 }
 0xb4f   :  { %v2900_v53 = vadd.f32 %v1266_v49, %v1254_v48  ;;  %v1362_v26 = vpop.f32.mrf.mxu1 }
 0xb51   :  { %v1270_v30 = vsel %vm553_vm4, %v2900_v53, -inf }
 0xb52   :  { %1271 = vmax.xlane.f32.xlu0 %v1270_v30 }
 0xb54   :  { %v1255_v31 = vpop.f32.mrf.mxu2 }
 0xb55   :  { %v1268_v36 = vpop.f32.mrf.mxu3  ;;  %v1111_v31 = vsub.f32 %v2753_v51, %v2757_v39 }
 0xb5c   :  { %v1373_v40 = vpop.f32.mrf.mxu2 }
 0xb5d   :  { %v1386_v13 = vpop.f32.mrf.mxu3 }
 0xb5e   :  { %v1387_v42 = vadd.f32 %v1386_v13, %v1373_v40  ;;  %v1112_v40 = vmul.f32 1.442695, %v1111_v31 }
 0xb64   :  { %v1375_v59 = vpop.f32.mrf.mxu2 }
 0xb65   :  { %v1388_v54 = vpop.f32.mrf.mxu3 }
 0xbc5   :  { %v2904_v23 = vpop.xlane.xlu0 %1271 }
 0xbc6   :  { %vm1273_vm1 = vcmp.ge.f32.partialorder %v2900_v53, %v2904_v23  ;;  %v1290_v51 = vsub.f32 %v2900_v53, %v2904_v23 }
 0xbc7   :  { %v1274_v43 = vsel %vm1273_vm1, %v2379_v24, 29 }
 0xbc8   :  { %v1275_v14 = vsel %vm553_vm4, %v1274_v43, 2147483647  ;;  %v3202_v43 = vld [vmem:[#allocation15_spill] sm:$0xff] }
 0xbc9   :  { %v1277_v55 = vshra.s32 %v1275_v14, 16  ;;  %v1276_v6 = vand.u32 65535, %v1275_v14  ;;  %v3203_v14 = vld [vmem:[#allocation14_spill] sm:$0xff] }
 0xbcb   :  { %v1279_v60 = vcvt.s32.f32 %v1277_v55  ;;  %v1278_v2 = vcvt.s32.f32 %v1276_v6  ;;  %v753_v55 = vsub.f32 %v3203_v14, %v3202_v43 }
 0xbcd   :  { %1280 = vmin.xlane.f32.xlu1 %v1279_v60  ;;  %v754_v6 = vmul.f32 1.442695, %v753_v55 }
 0xc40   :  { %v1281_v15 = vpop.xlane.xlu1 %1280 }
 0xc41   :  { %vm1282_vm2 = vcmp.eq.f32.partialorder %v1279_v60, %v1281_v15  ;;  %v1287_v20 = vcvt.f32.s32 %v1281_v15 }
 0xc42   :  { %v1283_v0 = vsel %vm1282_vm2, %v1278_v2, inf }
 0xc43   :  { %1284 = vmin.xlane.f32.xlu2 %v1283_v0  ;;  %v1288_v28 = vshll.u32 %v1287_v20, 16  ;;  %v1291_v0 = vmul.f32 1.442695, %v1290_v51 }
 0xcb6   :  { %v1285_v27 = vpop.xlane.xlu2 %1284 }
 0xcb7   :  { %v1286_v32 = vcvt.f32.s32 %v1285_v27 }
 0xcb9   :  { %v1289_v47 = vadd.s32 %v1288_v28, %v1286_v32 }
 0xcbb   :  { %vm1334_vm5 = vcmp.eq.s32.totalorder %v2379_v24, %v1289_v47 }
 0xcbc   :  { %v1927_v48 = vsel %vm1334_vm5, 1.0, %v3171_v1 }
 0xcbd   :  { %v1337_v49 = vpack.c.bf16 %v1927_v48, %v1927_v48 }
 0xcbf   :  { %1928 = vmatmul.msk.bf16.vlgmr.msrb.gmra.mxu0 %vm355_vm3, %v1337_v49  ;;  %1929 = vmatmul.msk.bf16.vlgmr.msrb.gmra.mxu1 %vm355_vm3, %v1337_v49 }
 0xcc0   :  { %1543 = vmatpush.bf16.msrb.mxu0 %v2237_v8  ;;  %1556 = vmatpush.bf16.msrb.mxu1 %v2240_v12 }
 0xcc4   :  { %1544 = vmatpush.bf16.msrb.mxu0 %v2249_v21  ;;  %1557 = vmatpush.bf16.msrb.mxu1 %v2251_v25 }
 0xcc8   :  { %1545 = vmatpush.bf16.msrb.mxu0 %v2260_v34  ;;  %1558 = vmatpush.bf16.msrb.mxu1 %v2263_v38 }
 0xccc   :  { %1546 = vmatpush.bf16.msrb.mxu0 %v2272_v46  ;;  %1559 = vmatpush.bf16.msrb.mxu1 %v3172_v58 }
 0xcd0   :  { %1547 = vmatpush.bf16.msrb.mxu0 %v3173_v50  ;;  %1560 = vmatpush.bf16.msrb.mxu1 %v3174_v19 }
 0xcd4   :  { %1548 = vmatpush.bf16.msrb.mxu0 %v3182_v4  ;;  %1561 = vmatpush.bf16.msrb.mxu1 %v3183_v62 }
 0xcd8   :  { %1549 = vmatpush.bf16.msrb.mxu0 %v3177_v41  ;;  %1562 = vmatpush.bf16.msrb.mxu1 %v3178_v37 }
 0xcdc   :  { %1550 = vmatpush.bf16.msrb.mxu0 %v2336_v61  ;;  %1563 = vmatpush.bf16.msrb.mxu1 %v2339_v63  ;;  %v2949_v63 = vld [vmem:[%s3113_s6] sm:$0x1]  ;;  %s1693_s6 = sld [smem:[#allocation2 + $0x1]] }
 0xd3c   :  { %v1402_v8 = vpop.f32.mrf.mxu0  ;;  %v1415_v12 = vpop.f32.mrf.mxu1 }
 0xd3d   :  { %v1403_v21 = vadd.f32 %v1402_v8, %v1361_v22  ;;  %v1416_v25 = vadd.f32 %v1415_v12, %v1387_v42 }
 0xd3f   :  { %2015 = vtanh.f32 %v1403_v21 }
 0xd40   :  { %2017 = vtanh.f32 %v1416_v25 }
 0xd44   :  { %v1404_v34 = vpop.f32.mrf.mxu0  ;;  %v1417_v38 = vpop.f32.mrf.mxu1 }
 0xd45   :  { %v2016_v46 = vpop.eup %2015 }
 0xd46   :  { %v2018_v58 = vpop.eup %2017  ;;  %v1421_v50 = vpack.c.bf16 %v2016_v46, %v2016_v46 }
 0xd47   :  { %v1422_v19 = vpack.c.bf16 %v2018_v58, %v2018_v58 }
 0xd48   :  { %1431 = vmatmul.bf16.vlgmr.msra.gmra.mxu0 %v1421_v50  ;;  %1525 = vmatmul.bf16.vlgmr.msrb.gmra.mxu2 %v1421_v50 }
 0xd49   :  { %1444 = vmatmul.bf16.vlgmr.msra.gmra.mxu1 %v1422_v19  ;;  %1538 = vmatmul.bf16.vlgmr.msrb.gmra.mxu3 %v1422_v19 }
 0xd4a   :  { %1602 = vmatpush.bf16.msrb.mxu2 %v2786_v9  ;;  %1615 = vmatpush.bf16.msrb.mxu3 %v2792_v10 }
 0xd4e   :  { %1603 = vmatpush.bf16.msrb.mxu2 %v2800_v35  ;;  %1616 = vmatpush.bf16.msrb.mxu3 %v2806_v18 }
 0xd52   :  { %1604 = vmatpush.bf16.msrb.mxu2 %v2814_v3  ;;  %1617 = vmatpush.bf16.msrb.mxu3 %v2820_v7 }
 0xd56   :  { %1605 = vmatpush.bf16.msrb.mxu2 %v2828_v16  ;;  %1618 = vmatpush.bf16.msrb.mxu3 %v2834_v17 }
 0xd58   :  { %1551 = vmatmul.bf16.vlgmr.msrb.gmra.mxu0 %v1421_v50 }
 0xd59   :  { %1564 = vmatmul.bf16.vlgmr.msrb.gmra.mxu1 %v1422_v19 }
 0xd5a   :  { %1606 = vmatpush.bf16.msrb.mxu2 %v2842_v29  ;;  %1619 = vmatpush.bf16.msrb.mxu3 %v2848_v33 }
 0xd5e   :  { %1607 = vmatpush.bf16.msrb.mxu2 %v2856_v44  ;;  %1620 = vmatpush.bf16.msrb.mxu3 %v2862_v45 }
 0xd62   :  { %1608 = vmatpush.bf16.msrb.mxu2 %v2870_v56  ;;  %1621 = vmatpush.bf16.msrb.mxu3 %v2876_v57  ;;  %v3200_v56 = vld [vmem:[#allocation31_spill] sm:$0xff]  ;;  %v3201_v57 = vld [vmem:[#allocation30_spill] sm:$0xff] }
 0xd66   :  { %1609 = vmatpush.bf16.msrb.mxu2 %v2884_v5  ;;  %1622 = vmatpush.bf16.msrb.mxu3 %v2890_v11  ;;  %v574_v5 = vsub.f32 %v3201_v57, %v3200_v56 }
 0xd68   :  { %v575_v22 = vmul.f32 1.442695, %v574_v5 }
 0xd6a   :  { %2019 = vpow2.f32 %v575_v22 }
 0xd6b   :  { %2021 = vpow2.f32 %v1112_v40 }
 0xd6c   :  { %2023 = vpow2.f32 %v754_v6 }
 0xd6d   :  { %2025 = vpow2.f32 %v1291_v0 }
 0xd70   :  { %v2020_v13 = vpop.eup %2019 }
 0xd71   :  { %v577_v42 = vsel %vm553_vm4, %v2020_v13, 0.0  ;;  %v2022_v59 = vpop.eup %2021 }
 0xd72   :  { %v1114_v54 = vsel %vm553_vm4, %v2022_v59, 0.0  ;;  %v2976_v20 = vpop.eup %2023 }
 0xd73   :  { %v756_v28 = vsel %vm553_vm4, %v2976_v20, 0.0  ;;  %v2980_v32 = vpop.eup %2025 }
 0xd74   :  { %v1293_v49 = vsel %vm553_vm4, %v2980_v32, 0.0 }
 0xdc5   :  { %v1432_v61 = vpop.f32.mrf.mxu0 }
 0xdc6   :  { %v1433_v41 = vadd.f32 %v2949_v63, %v1432_v61  ;;  %v1445_v37 = vpop.f32.mrf.mxu1 }
 0xdc8   :  { %v2952_v4 = vadd.f32 %v1445_v37, %v1433_v41 }
 0xdca   :  { %v1449_v62 = vsel %vm553_vm4, %v2952_v4, -inf }
 0xdcb   :  { %v1526_v9 = vpop.f32.mrf.mxu2  ;;  %1450 = vmax.xlane.f32.xlu0 %v1449_v62 }
 0xdcc   :  { %v1539_v10 = vpop.f32.mrf.mxu3 }
 0xdcd   :  { %v2956_v35 = vadd.f32 %v1539_v10, %v1526_v9  ;;  %v1434_v18 = vpop.f32.mrf.mxu0 }
 0xdce   :  { %v1447_v3 = vpop.f32.mrf.mxu1 }
 0xdd3   :  { %v1528_v7 = vpop.f32.mrf.mxu2 }
 0xdd4   :  { %v1541_v16 = vpop.f32.mrf.mxu3 }
 0xdd5   :  { %v1552_v17 = vpop.f32.mrf.mxu0 }
 0xdd6   :  { %v1565_v29 = vpop.f32.mrf.mxu1 }
 0xdd7   :  { %v2958_v33 = vadd.f32 %v1565_v29, %v1552_v17 }
 0xddd   :  { %v1554_v44 = vpop.f32.mrf.mxu0 }
 0xdde   :  { %v1567_v45 = vpop.f32.mrf.mxu1 }
 0xe3e   :  { %v2962_v11 = vpop.xlane.xlu0 %1450 }
 0xe3f   :  { %vm1452_vm6 = vcmp.ge.f32.partialorder %v2952_v4, %v2962_v11 }
 0xe40   :  { %v1453_v52 = vsel %vm1452_vm6, %v2379_v24, 29 }
 0xe41   :  { %v1454_v26 = vsel %vm553_vm4, %v1453_v52, 2147483647 }
 0xe42   :  { %v1456_v30 = vshra.s32 %v1454_v26, 16  ;;  %v1455_v60 = vand.u32 65535, %v1454_v26 }
 0xe44   :  { %v1458_v36 = vcvt.s32.f32 %v1456_v30  ;;  %v1457_v15 = vcvt.s32.f32 %v1455_v60 }
 0xe46   :  { %1459 = vmin.xlane.f32.xlu1 %v1458_v36 }
 0xe4e   :  { %578 = vadd.xlane.f32.xlu1 %v577_v42 }
 0xe56   :  { %1115 = vadd.xlane.f32.xlu1 %v1114_v54 }
 0xeb9   :  { %v1460_v39 = vpop.xlane.xlu1 %1459 }
 0xeba   :  { %vm1461_vm7 = vcmp.eq.f32.partialorder %v1458_v36, %v1460_v39  ;;  %v1466_v22 = vcvt.f32.s32 %v1460_v39 }
 0xebb   :  { %v1462_v2 = vsel %vm1461_vm7, %v1457_v15, inf }
 0xebc   :  { %1463 = vmin.xlane.f32.xlu2 %v1462_v2  ;;  %v1467_v26 = vshll.u32 %v1466_v22, 16 }
 0xec1   :  { %v579_v27 = vpop.xlane.xlu1 %578 }
 0xec2   :  { %2027 = vrcp.f32 %v579_v27  ;;  %v591_v8 = vand.u32 2147483648, %v579_v27  ;;  %v589_v21 = vand.u32 2147483647, %v579_v27  ;;  %vm585_vm9 = vweird.f32 %v579_v27 }
 0xec4   :  { %757 = vadd.xlane.f32.xlu2 %v756_v28  ;;  %v592_v38 = vor.u32 1.1754944e-38, %v591_v8  ;;  %vm590_vm11 = vcmp.eq.f32.partialorder %v589_v21, 8.507059e+37  ;;  %v3204_v28 = vld [vmem:[#allocation19_spill] sm:$0xff] }
 0xec8   :  { %v2028_v47 = vpop.eup %2027 }
 0xec9   :  { %v581_v53 = vmul.f32 %v2028_v47, %v579_v27  ;;  %v1116_v23 = vpop.xlane.xlu1 %1115  ;;  %vm586_vm8 = vweird.f32 %v2028_v47 }
 0xeca   :  { %2029 = vrcp.f32 %v1116_v23  ;;  %vm587_vm10 = vmor %vm585_vm9, %vm586_vm8  ;;  %v1128_v41 = vand.u32 2147483648, %v1116_v23  ;;  %v1126_v62 = vand.u32 2147483647, %v1116_v23  ;;  %vm1122_vm13 = vweird.f32 %v1116_v23 }
 0xecb   :  { %v582_v48 = vsub.f32 1.0, %v581_v53 }
 0xecc   :  { %1294 = vadd.xlane.f32.xlu2 %v1293_v49  ;;  %v1129_v3 = vor.u32 1.1754944e-38, %v1128_v41  ;;  %vm1127_vm15 = vcmp.eq.f32.partialorder %v1126_v62, 8.507059e+37  ;;  %v1469_v41 = vsub.f32 %v2952_v4, %v2962_v11 }
 0xecd   :  { %v583_v12 = vmul.f32 %v2028_v47, %v582_v48 }
 0xecf   :  { %v584_v25 = vadd.f32 %v2028_v47, %v583_v12 }
 0xed0   :  { %v2030_v34 = vpop.eup %2029 }
 0xed1   :  { %v588_v46 = vsel %vm587_vm10, %v2028_v47, %v584_v25  ;;  %v1118_v58 = vmul.f32 %v2030_v34, %v1116_v23  ;;  %vm1123_vm12 = vweird.f32 %v2030_v34  ;;  %v3205_v47 = vld [vmem:[#allocation16_spill] sm:$0xff] }
 0xed2   :  { %v2984_v50 = vsel %vm590_vm11, %v592_v38, %v588_v46  ;;  %vm1124_vm14 = vmor %vm1122_vm13, %vm1123_vm12  ;;  %v932_v53 = vsub.f32 %v3205_v47, %v3204_v28 }
 0xed3   :  { %v1119_v19 = vsub.f32 1.0, %v1118_v58  ;;  %v2987_v61 = vmul.f32 %v2020_v13, %v2984_v50 }
 0xed4   :  { %v933_v8 = vmul.f32 1.442695, %v932_v53 }
 0xed5   :  { %v1120_v37 = vmul.f32 %v2030_v34, %v1119_v19  ;;  %v596_v9 = vsub.f32 %v2987_v61, %v2984_v50 }
 0xed7   :  { %v1121_v10 = vadd.f32 %v2030_v34, %v1120_v37  ;;  %v597_v18 = vmul.f32 1.442695, %v596_v9 }
 0xed9   :  { %v1125_v7 = vsel %vm1124_vm14, %v2030_v34, %v1121_v10  ;;  %2031 = vpow2.f32 %v597_v18  ;;  %v1470_v18 = vmul.f32 1.442695, %v1469_v41 }
 0xeda   :  { %v2991_v16 = vsel %vm1127_vm15, %v1129_v3, %v1125_v7 }
 0xedb   :  { %v2994_v17 = vmul.f32 %v2022_v59, %v2991_v16 }
 0xedd   :  { %v1133_v29 = vsub.f32 %v2994_v17, %v2991_v16 }
 0xedf   :  { %v2032_v44 = vpop.eup %2031  ;;  %v1134_v45 = vmul.f32 1.442695, %v1133_v29 }
 0xee0   :  { %v599_v56 = vsel %vm553_vm4, %v2032_v44, 0.0 }
 0xee1   :  { %600 = vadd.xlane.f32.xlu2 %v599_v56  ;;  %2033 = vpow2.f32 %v1134_v45 }
 0xee7   :  { %v2034_v57 = vpop.eup %2033 }
 0xee8   :  { %v1136_v5 = vsel %vm553_vm4, %v2034_v57, 0.0 }
 0xee9   :  { %1137 = vadd.xlane.f32.xlu2 %v1136_v5 }
 0xf2f   :  { %v1464_v52 = vpop.xlane.xlu2 %1463 }
 0xf30   :  { %v1465_v30 = vcvt.f32.s32 %v1464_v52 }
 0xf32   :  { %v1468_v31 = vadd.s32 %v1467_v26, %v1465_v30 }
 0xf34   :  { %vm1513_vm0 = vcmp.eq.s32.totalorder %v2379_v24, %v1468_v31 }
 0xf35   :  { %v1932_v36 = vsel %vm1513_vm0, 1.0, %v3171_v1 }
 0xf36   :  { %v1516_v40 = vpack.c.bf16 %v1932_v36, %v1932_v36 }
 0xf37   :  { %v758_v1 = vpop.xlane.xlu2 %757 }
 0xf38   :  { %1933 = vmatmul.msk.bf16.vlgmr.msra.gmra.mxu2 %vm355_vm3, %v1516_v40  ;;  %1934 = vmatmul.msk.bf16.vlgmr.msra.gmra.mxu3 %vm355_vm3, %v1516_v40  ;;  %v770_v49 = vand.u32 2147483648, %v758_v1  ;;  %vm764_vm1 = vweird.f32 %v758_v1  ;;  %v768_v12 = vand.u32 2147483647, %v758_v1 }
 0xf3a   :  { %v771_v58 = vor.u32 1.1754944e-38, %v770_v49  ;;  %vm769_vm5 = vcmp.eq.f32.partialorder %v768_v12, 8.507059e+37 }
 0xf3f   :  { %v1295_v39 = vpop.xlane.xlu2 %1294 }
 0xf40   :  { %v1307_v10 = vand.u32 2147483648, %v1295_v39  ;;  %vm1301_vm7 = vweird.f32 %v1295_v39 }
 0xf42   :  { %v1308_v44 = vor.u32 1.1754944e-38, %v1307_v10 }
 0xfbb   :  { %v1581_v13 = vpop.f32.mrf.mxu2  ;;  %v1594_v42 = vpop.f32.mrf.mxu3 }
 0xfbc   :  { %v1582_v59 = vadd.f32 %v1581_v13, %v2956_v35  ;;  %v1595_v54 = vadd.f32 %v1594_v42, %v2958_v33 }
 0xfbe   :  { %2035 = vtanh.f32 %v1582_v59  ;;  %v1142_v59 = vstv %s1915_s15 }
 0xfbf   :  { %2037 = vtanh.f32 %v1595_v54  ;;  %vm1143_vm11 = vcmp.eq.s32.totalorder %v2379_v24, %v1142_v59 }
 0xfc0   :  { %2039 = vrcp.f32 %v758_v1 }
 0xfc1   :  { %2041 = vrcp.f32 %v1295_v39 }
 0xfc2   :  { %2043 = vpow2.f32 %v933_v8 }
 0xfc3   :  { %v1583_v43 = vpop.f32.mrf.mxu2  ;;  %v1596_v14 = vpop.f32.mrf.mxu3  ;;  %2045 = vpow2.f32 %v1470_v18 }
 0xfc4   :  { %v2036_v55 = vpop.eup %2035  ;;  %v1144_v43 = vsel %vm1143_vm11, %v2994_v17, 0.0 }
 0xfc5   :  { %v2038_v60 = vpop.eup %2037  ;;  %v1600_v6 = vpack.c.bf16 %v2036_v55, %v2036_v55  ;;  %v1145_v14 = vsel %vm553_vm4, %v1144_v43, 0.0 }
 0xfc6   :  { %v1601_v51 = vpack.c.bf16 %v2038_v60, %v2038_v60  ;;  %v2040_v15 = vpop.eup %2039 }
 0xfc7   :  { %1610 = vmatmul.bf16.vlgmr.msrb.gmra.mxu2 %v1600_v6  ;;  %v760_v2 = vmul.f32 %v2040_v15, %v758_v1  ;;  %v2042_v35 = vpop.eup %2041  ;;  %vm765_vm3 = vweird.f32 %v2040_v15 }
 0xfc8   :  { %1623 = vmatmul.bf16.vlgmr.msrb.gmra.mxu3 %v1601_v51  ;;  %v1297_v33 = vmul.f32 %v2042_v35, %v1295_v39  ;;  %vm766_vm2 = vmor %vm764_vm1, %vm765_vm3  ;;  %vm1302_vm6 = vweird.f32 %v2042_v35  ;;  %v3018_v4 = vpop.eup %2043 }
 0xfc9   :  { %v761_v0 = vsub.f32 1.0, %v760_v2  ;;  %vm1303_vm8 = vmor %vm1301_vm7, %vm1302_vm6  ;;  %v935_v56 = vsel %vm553_vm4, %v3018_v4, 0.0  ;;  %v3030_v22 = vpop.eup %2045 }
 0xfca   :  { %v1298_v48 = vsub.f32 1.0, %v1297_v33  ;;  %v1472_v26 = vsel %vm553_vm4, %v3030_v22, 0.0 }
 0xfcb   :  { %v762_v27 = vmul.f32 %v2040_v15, %v761_v0 }
 0xfcc   :  { %v1299_v46 = vmul.f32 %v2042_v35, %v1298_v48 }
 0xfcd   :  { %v763_v23 = vadd.f32 %v2040_v15, %v762_v27 }
 0xfce   :  { %v1300_v9 = vadd.f32 %v2042_v35, %v1299_v46 }
 0xfcf   :  { %v767_v38 = vsel %vm766_vm2, %v2040_v15, %v763_v23 }
 0xfd0   :  { %v3012_v62 = vsel %vm769_vm5, %v771_v58, %v767_v38  ;;  %v1304_v11 = vsel %vm1303_vm8, %v2042_v35, %v1300_v9 }
 0xfd1   :  { %v3016_v7 = vmul.f32 %v2976_v20, %v3012_v62 }
 0xfd3   :  { %v775_v45 = vsub.f32 %v3016_v7, %v3012_v62 }
 0xfd5   :  { %v776_v5 = vmul.f32 1.442695, %v775_v45 }
 0xfd7   :  { %2047 = vpow2.f32 %v776_v5 }
 0xfdd   :  { %v2048_v31 = vpop.eup %2047 }
 0xfde   :  { %v778_v36 = vsel %vm553_vm4, %v2048_v31, 0.0 }
0x104a   :  { %v1611_v21 = vpop.f32.mrf.mxu2 }
0x104b   :  { %v1612_v25 = vadd.f32 %v2949_v63, %v1611_v21  ;;  %v1624_v34 = vpop.f32.mrf.mxu3  ;;  %v1305_v63 = vand.u32 2147483647, %v1295_v39 }
0x104d   :  { %v1625_v19 = vadd.f32 %v1624_v34, %v1612_v25  ;;  %vm1306_vm9 = vcmp.eq.f32.partialorder %v1305_v63, 8.507059e+37 }
0x104e   :  { %v3024_v57 = vsel %vm1306_vm9, %v1308_v44, %v1304_v11  ;;  %v1321_v44 = vstv %s1920_s17 }
0x104f   :  { %v1628_v37 = vsel %vm553_vm4, %v1625_v19, -inf  ;;  %v3028_v20 = vmul.f32 %v2980_v32, %v3024_v57  ;;  %v605_v32 = vstv %s1693_s6  ;;  %vm1322_vm6 = vcmp.eq.s32.totalorder %v2379_v24, %v1321_v44 }
0x1050   :  { %1629 = vmax.xlane.f32.xlu0 %v1628_v37  ;;  %vm606_vm10 = vcmp.eq.s32.totalorder %v2379_v24, %v605_v32  ;;  %v1662_v32 = vstv %s1930_s18  ;;  %v970_v44 = vstv %s796_s27 }
0x1051   :  { %v1312_v52 = vsub.f32 %v3028_v20, %v3024_v57  ;;  %v607_v42 = vsel %vm606_vm10, %v2987_v61, 0.0  ;;  %vm1663_vm11 = vcmp.eq.s32.totalorder %v2379_v24, %v1662_v32 }
0x1052   :  { %v1613_v3 = vpop.f32.mrf.mxu2  ;;  %v608_v54 = vsel %vm553_vm4, %v607_v42, 0.0 }
0x1053   :  { %v1626_v29 = vpop.f32.mrf.mxu3  ;;  %v1313_v30 = vmul.f32 1.442695, %v1312_v52 }
0x1054   :  { %v784_v29 = vstv %s1905_s16 }
0x1055   :  { %2049 = vpow2.f32 %v1313_v30  ;;  %vm785_vm5 = vcmp.eq.s32.totalorder %v2379_v24, %v784_v29 }
0x1056   :  { %v786_v11 = vsel %vm785_vm5, %v3016_v7, 0.0 }
0x1057   :  { %v787_v45 = vsel %vm553_vm4, %v786_v11, 0.0 }
0x1058   :  { %936 = vadd.xlane.f32.xlu0 %v935_v56  ;;  %v1323_v56 = vsel %vm1322_vm6, %v3028_v20, 0.0 }
0x1059   :  { %v1324_v5 = vsel %vm553_vm4, %v1323_v56, 0.0 }
0x105b   :  { %v2050_v40 = vpop.eup %2049 }
0x105c   :  { %v1315_v13 = vsel %vm553_vm4, %v2050_v40, 0.0 }
0x1060   :  { %1473 = vadd.xlane.f32.xlu0 %v1472_v26 }
0x1068   :  { %779 = vadd.xlane.f32.xlu0 %v778_v36 }
0x1070   :  { %1316 = vadd.xlane.f32.xlu0 %v1315_v13 }
0x1078   :  { %609 = vadd.xlane.f32.xlu0 %v608_v54 }
0x1080   :  { %1146 = vadd.xlane.f32.xlu0 %v1145_v14 }
0x10c3   :  { %v1630_v55 = vpop.xlane.xlu0 %1629 }
0x10c4   :  { %v1631_v60 = vsub.f32 %v1625_v19, %v1630_v55 }
0x10c6   :  { %v1632_v6 = vmul.f32 1.442695, %v1631_v60 }
0x10c8   :  { %2051 = vpow2.f32 %v1632_v6  ;;  %v963_v6 = vstv %s1910_s19 }
0x10cb   :  { %v937_v51 = vpop.xlane.xlu0 %936 }
0x10cc   :  { %2053 = vrcp.f32 %v937_v51  ;;  %v949_v0 = vand.u32 2147483648, %v937_v51  ;;  %v947_v27 = vand.u32 2147483647, %v937_v51  ;;  %vm943_vm13 = vweird.f32 %v937_v51 }
0x10ce   :  { %v3044_v1 = vpop.eup %2051  ;;  %v950_v47 = vor.u32 1.1754944e-38, %v949_v0  ;;  %vm948_vm15 = vcmp.eq.f32.partialorder %v947_v27, 8.507059e+37  ;;  %v601_v0 = vpop.xlane.xlu2 %600 }
0x10cf   :  { %v1634_v61 = vsel %vm553_vm4, %v3044_v1, 0.0 }
0x10d0   :  { %1635 = vadd.xlane.f32.xlu1 %v1634_v61 }
0x10d2   :  { %v2054_v39 = vpop.eup %2053 }
0x10d3   :  { %v939_v15 = vmul.f32 %v2054_v39, %v937_v51  ;;  %v1474_v2 = vpop.xlane.xlu0 %1473  ;;  %vm944_vm12 = vweird.f32 %v2054_v39 }
0x10d4   :  { %2055 = vrcp.f32 %v1474_v2  ;;  %vm945_vm14 = vmor %vm943_vm13, %vm944_vm12  ;;  %v1486_v12 = vand.u32 2147483648, %v1474_v2  ;;  %v1484_v25 = vand.u32 2147483647, %v1474_v2  ;;  %vm1480_vm3 = vweird.f32 %v1474_v2 }
0x10d5   :  { %v940_v17 = vsub.f32 1.0, %v939_v15  ;;  %vm964_vm12 = vcmp.eq.s32.totalorder %v2379_v24, %v963_v6 }
0x10d6   :  { %v1487_v58 = vor.u32 1.1754944e-38, %v1486_v12  ;;  %vm1485_vm2 = vcmp.eq.f32.partialorder %v1484_v25, 8.507059e+37 }
0x10d7   :  { %v941_v35 = vmul.f32 %v2054_v39, %v940_v17 }
0x10d9   :  { %v942_v33 = vadd.f32 %v2054_v39, %v941_v35 }
0x10da   :  { %v2056_v28 = vpop.eup %2055 }
0x10db   :  { %v946_v53 = vsel %vm945_vm14, %v2054_v39, %v942_v33  ;;  %v1476_v23 = vmul.f32 %v2056_v28, %v1474_v2  ;;  %vm1481_vm0 = vweird.f32 %v2056_v28  ;;  %v780_v17 = vpop.xlane.xlu0 %779  ;;  %v1138_v33 = vpop.xlane.xlu2 %1137 }
0x10dc   :  { %v3048_v48 = vsel %vm948_vm15, %v950_v47, %v946_v53  ;;  %vm1482_vm1 = vmor %vm1480_vm3, %vm1481_vm0 }
0x10dd   :  { %v1477_v49 = vsub.f32 1.0, %v1476_v23  ;;  %v3052_v8 = vmul.f32 %v3018_v4, %v3048_v48 }
0x10df   :  { %v1478_v21 = vmul.f32 %v2056_v28, %v1477_v49  ;;  %v954_v34 = vsub.f32 %v3052_v8, %v3048_v48  ;;  %v965_v61 = vsel %vm964_vm12, %v3052_v8, 0.0 }
0x10e0   :  { %v966_v39 = vsel %vm553_vm4, %v965_v61, 0.0  ;;  %v1669_v61 = vstv %s1512_s10 }
0x10e1   :  { %v1479_v38 = vadd.f32 %v2056_v28, %v1478_v21  ;;  %v955_v46 = vmul.f32 1.442695, %v954_v34 }
0x10e3   :  { %v1483_v19 = vsel %vm1482_vm1, %v2056_v28, %v1479_v38  ;;  %2057 = vpow2.f32 %v955_v46  ;;  %v1317_v27 = vpop.xlane.xlu0 %1316 }
0x10e4   :  { %v3056_v41 = vsel %vm1485_vm2, %v1487_v58, %v1483_v19 }
0x10e5   :  { %v1490_v37 = vmul.f32 %v3030_v22, %v3056_v41 }
0x10e7   :  { %v1491_v9 = vsub.f32 %v1490_v37, %v3056_v41 }
0x10e9   :  { %v2058_v10 = vpop.eup %2057  ;;  %v1492_v18 = vmul.f32 1.442695, %v1491_v9  ;;  %v791_v9 = vstv %s617_s24 }
0x10ea   :  { %v957_v63 = vsel %vm553_vm4, %v2058_v10, 0.0 }
0x10eb   :  { %958 = vadd.xlane.f32.xlu1 %v957_v63  ;;  %2059 = vpow2.f32 %v1492_v18  ;;  %v610_v23 = vpop.xlane.xlu0 %609  ;;  %v612_v18 = vstv %s76_s25 }
0x10f1   :  { %v2060_v3 = vpop.eup %2059 }
0x10f2   :  { %v1494_v4 = vsel %vm553_vm4, %v2060_v3, 0.0 }
0x10f3   :  { %1495 = vadd.xlane.f32.xlu1 %v1494_v4 }
0x10fb   :  { %788 = vadd.xlane.f32.xlu1 %v787_v45 }
0x1103   :  { %1325 = vadd.xlane.f32.xlu1 %v1324_v5 }
0x1143   :  { %v1636_v22 = vpop.xlane.xlu1 %1635 }
0x1144   :  { %2061 = vrcp.f32 %v1636_v22  ;;  %v1648_v31 = vand.u32 2147483648, %v1636_v22  ;;  %v1646_v7 = vand.u32 2147483647, %v1636_v22  ;;  %vm1642_vm8 = vweird.f32 %v1636_v22 }
0x1146   :  { %v1649_v13 = vor.u32 1.1754944e-38, %v1648_v31  ;;  %vm1647_vm10 = vcmp.eq.f32.partialorder %v1646_v7, 8.507059e+37 }
0x114a   :  { %v2062_v52 = vpop.eup %2061 }
0x114b   :  { %v1638_v26 = vmul.f32 %v2062_v52, %v1636_v22  ;;  %vm1643_vm7 = vweird.f32 %v2062_v52 }
0x114c   :  { %vm1644_vm9 = vmor %vm1642_vm8, %vm1643_vm7 }
0x114d   :  { %v1639_v30 = vsub.f32 1.0, %v1638_v26  ;;  %v1149_v26 = vstv %s975_s29 }
0x114f   :  { %v1640_v36 = vmul.f32 %v2062_v52, %v1639_v30 }
0x1151   :  { %v1641_v40 = vadd.f32 %v2062_v52, %v1640_v36 }
0x1153   :  { %v1645_v42 = vsel %vm1644_vm9, %v2062_v52, %v1641_v40 }
0x1154   :  { %v3069_v20 = vsel %vm1647_vm10, %v1649_v13, %v1645_v42  ;;  %v1328_v42 = vstv %s1154_s8 }
0x1155   :  { %v1652_v59 = vmul.f32 %v3044_v1, %v3069_v20  ;;  %v1500_v1 = vstv %s1925_s20 }
0x1156   :  { %vm1501_vm13 = vcmp.eq.s32.totalorder %v2379_v24, %v1500_v1 }
0x1157   :  { %v1653_v54 = vsub.f32 %v1652_v59, %v3069_v20  ;;  %v1664_v43 = vsel %vm1663_vm11, %v1652_v59, 0.0  ;;  %v1502_v15 = vsel %vm1501_vm13, %v1490_v37, 0.0 }
0x1158   :  { %v1665_v14 = vsel %vm553_vm4, %v1664_v43, 0.0  ;;  %v1503_v2 = vsel %vm553_vm4, %v1502_v15, 0.0 }
0x1159   :  { %v1654_v55 = vmul.f32 1.442695, %v1653_v54  ;;  %1666 = vadd.xlane.f32.xlu0 %v1665_v14  ;;  %v1507_v14 = vstv %s1333_s9 }
0x115b   :  { %2063 = vpow2.f32 %v1654_v55 }
0x115c   :  { %2065 = vlog2.f32 %v780_v17 }
0x115d   :  { %2067 = vlog2.f32 %v601_v0 }
0x115e   :  { %v959_v35 = vpop.xlane.xlu1 %958  ;;  %2069 = vlog2.f32 %v1138_v33 }
0x115f   :  { %2071 = vlog2.f32 %v959_v35 }
0x1160   :  { %2073 = vlog2.f32 %v1317_v27 }
0x1161   :  { %v2064_v60 = vpop.eup %2063 }
0x1162   :  { %v1656_v51 = vsel %vm553_vm4, %v2064_v60, 0.0  ;;  %v2066_v47 = vpop.eup %2065  ;;  %vm1672_vm4 = vcmask 0  }
0x1163   :  { %1657 = vadd.xlane.f32.xlu2 %v1656_v51  ;;  %v2068_v53 = vpop.eup %2067  ;;  %v782_v24 = vmul.f32 0.6931472, %v2066_v47 }
0x1164   :  { %v2070_v49 = vpop.eup %2069  ;;  %v603_v8 = vmul.f32 0.6931472, %v2068_v53 }
0x1165   :  { %v2072_v12 = vpop.eup %2071  ;;  %v783_v34 = vadd.f32 %v782_v24, %v3012_v62  ;;  %v1140_v38 = vmul.f32 0.6931472, %v2070_v49  ;;  %v1147_v62 = vpop.xlane.xlu0 %1146 }
0x1166   :  { %v1496_v28 = vpop.xlane.xlu1 %1495  ;;  %v604_v46 = vadd.f32 %v603_v8, %v2984_v50  ;;  %v961_v58 = vmul.f32 0.6931472, %v2072_v12  ;;  %v2074_v37 = vpop.eup %2073 }
0x1167   :  { %v1319_v3 = vmul.f32 0.6931472, %v2074_v37  ;;  %v1141_v29 = vadd.f32 %v1140_v38, %v2991_v16 }
0x1168   :  { %v611_v10 = vsub.f32 %v604_v46, %v610_v23  ;;  %v962_v50 = vadd.f32 %v961_v58, %v3048_v48 }
0x1169   :  { %v1148_v5 = vsub.f32 %v1141_v29, %v1147_v62  ;;  %v1320_v7 = vadd.f32 %v1319_v3, %v3024_v57 }
0x116a   :  { %v613_v56 = vmul.f32 %v612_v18, %v611_v10 }
0x116b   :  { %967 = vadd.xlane.f32.xlu2 %v966_v39  ;;  %v1150_v40 = vmul.f32 %v1149_v26, %v1148_v5 }
0x116e   :  { %v789_v21 = vpop.xlane.xlu1 %788 }
0x116f   :  { %v790_v19 = vsub.f32 %v783_v34, %v789_v21 }
0x1171   :  { %v792_v4 = vmul.f32 %v791_v9, %v790_v19 }
0x1173   :  { %1504 = vadd.xlane.f32.xlu2 %v1503_v2  ;;  %v793_v36 = vadd.f32 %v792_v4, %v613_v56 }
0x1176   :  { %v1326_v30 = vpop.xlane.xlu1 %1325 }
0x1177   :  { %v1327_v32 = vsub.f32 %v1320_v7, %v1326_v30 }
0x1179   :  { %v1329_v60 = vmul.f32 %v1328_v42, %v1327_v32 }
0x11cc   :  { %v1667_v43 = vpop.xlane.xlu0 %1666 }
0x11d6   :  { %v1658_v25 = vpop.xlane.xlu2 %1657 }
0x11d7   :  { %2075 = vlog2.f32 %v1658_v25 }
0x11d8   :  { %2077 = vlog2.f32 %v1496_v28 }
0x11dd   :  { %v2076_v63 = vpop.eup %2075 }
0x11de   :  { %v2078_v11 = vpop.eup %2077  ;;  %v968_v45 = vpop.xlane.xlu2 %967  ;;  %v1660_v22 = vmul.f32 0.6931472, %v2076_v63 }
0x11df   :  { %v969_v52 = vsub.f32 %v962_v50, %v968_v45  ;;  %v1498_v31 = vmul.f32 0.6931472, %v2078_v11 }
0x11e0   :  { %v1661_v48 = vadd.f32 %v1660_v22, %v3069_v20 }
0x11e1   :  { %v971_v16 = vmul.f32 %v970_v44, %v969_v52  ;;  %v1499_v54 = vadd.f32 %v1498_v31, %v3056_v41 }
0x11e2   :  { %v1668_v6 = vsub.f32 %v1661_v48, %v1667_v43 }
0x11e3   :  { %v972_v13 = vadd.f32 %v971_v16, %v793_v36 }
0x11e4   :  { %v1670_v39 = vmul.f32 %v1669_v61, %v1668_v6 }
0x11e5   :  { %v1151_v59 = vadd.f32 %v1150_v40, %v972_v13 }
0x11e6   :  { %v1505_v55 = vpop.xlane.xlu2 %1504 }
0x11e7   :  { %v1506_v51 = vsub.f32 %v1499_v54, %v1505_v55  ;;  %v1330_v57 = vadd.f32 %v1329_v60, %v1151_v59 }
0x11e9   :  { %v1508_v1 = vmul.f32 %v1507_v14, %v1506_v51 }
0x11eb   :  { %v1509_v20 = vadd.f32 %v1508_v1, %v1330_v57 }
0x11ed   :  { %v1671_v15 = vadd.f32 %v1670_v39, %v1509_v20 }
0x11ef   :  { %1673 = vst.msk [vmem:[#allocation9] sm:$0x1] %vm1672_vm4, %v1671_v15 }
0x11f0   :  { %1684 = dma.vmem_to_hbm [thread:$0]  %s1680_s3, 16, %s1682_s14, [#allocation4]  }
0x11f1   :  { %2174 = dma.done.wait [#allocation4], 16  }
0x11f2   :  { %2175 = vsyncadd [#allocation4], 4294967280 }
0x11f3   :  { %1689 = vsyncpa [#allocation3], 1 }
0x11f4   :  { %1690 = vsyncpa [#allocation4], 1 }
0x11f5   :  { %1691 = vsyncpa [#allocation5], 1 }
0x11f6   :  { %1692 = vsyncpa [#allocation7], 1 }

</bundles_post_ra>
